<compile_context>
chip_gen: v5e
topology: v5e:2x2
jax: 0.10.0
libtpu: 0.0.40
codegen_flags: <defaults>
</compile_context>

<pallas_src>
import jax
import jax.numpy as jnp
from jax.experimental import pallas as pl
from jax.experimental.pallas import tpu as pltpu


# ----------------------------- configuration -------------------------------
B = 2              # batch
S = 16             # sequence length
VOCAB = 50         # synthetic vocab for the BERT stand-in
HB = 32            # "bert" hidden size (stand-in)
NF = 16            # num_filters
FILTER_SIZES = (3, 4, 5)
H = 32             # hidden_dim
FEAT_DIM = 7       # feature_dim (last column = language id)
NUM_LANG = 7
NUM_CLASSES = 2

F3 = NF * len(FILTER_SIZES)          # 48  (cnn output width)
G6 = 6 * H                           # 192 (packed bidir gates, forget gate dropped)
KMAX = max(FILTER_SIZES)


def _align(x, m):
    return ((x + m - 1) // m) * m


SPS = _align(S, 8)                         # per-batch row stride in seq scratch (16)
ACC_ROWS = B * SPS                         # conv matmul M dimension (32)
SEQ_ROWS = _align(ACC_ROWS + KMAX - 1, 8)  # 40 (tap t=KMAX-1 reads up to row 35)

# ---- bias slab layout (one (1, BIAS_LEN) vector, 128-aligned lane offsets) ----
OFF_CONVB = 0
OFF_B0    = _align(OFF_CONVB + F3, 128)    # 128
OFF_B1    = _align(OFF_B0 + G6, 128)       # 384
OFF_BF1   = _align(OFF_B1 + G6, 128)       # 576
OFF_BF2   = _align(OFF_BF1 + H, 128)       # 640
OFF_BC1   = _align(OFF_BF2 + H, 128)       # 768
OFF_BC2   = _align(OFF_BC1 + H, 128)       # 896
BIAS_LEN  = _align(OFF_BC2 + H, 128)       # 1024

# ---- head weight slab layout (rows, 8-aligned starts, H=32 columns) ----
ROW_WF1 = 0                                    # (FEAT_DIM-1, H)
ROW_WF2 = _align(ROW_WF1 + (FEAT_DIM - 1), 8)  # 8   (H, H)
ROW_EMB = _align(ROW_WF2 + H, 8)               # 40  (NUM_LANG, H)
ROW_WC1 = _align(ROW_EMB + NUM_LANG, 8)        # 48  (4H, H)
ROW_WC2 = _align(ROW_WC1 + 4 * H, 8)           # 176 (H, H) — cols >= NUM_CLASSES zero
HEADW_ROWS = _align(ROW_WC2 + H, 8)            # 208

# ---- LSTM weight slab layout (rows) ----
ROW_W0 = 0                                     # (F3, 6H)
ROW_W1 = F3                                    # (2H, 6H)
LSTMW_ROWS = ROW_W1 + 2 * H                    # 112

VMEM_SPEC = pl.BlockSpec(memory_space=pltpu.MemorySpace.VMEM)
SMEM_SPEC = pl.BlockSpec(memory_space=pltpu.MemorySpace.SMEM)


# ------------------------------ fused kernel --------------------------------
def _fused_hybrid_kernel(ids_ref, mask_ref, feat_ref, tok_ref, convw_ref,
                         convmask_ref, lstmw_ref, headw_ref, bias_ref,
                         out_ref, seq_ref):
    def bias(off, width):
        return bias_ref[:, off:off + width]      # (1, width)

    # ----- BERT stand-in: token embedding gather + attention mask (in-kernel) ----
    # TODO(synk): stand-in for the pretrained BERT encoder.
    seq_ref[...] = jnp.zeros_like(seq_ref)       # zero tail / pad rows once
    for b in range(B):                           # static unroll, B*S tiny row gathers
        for s in range(S):
            tid = ids_ref[b, s]                  # SMEM scalar (dynamic row index)
            m = mask_ref[b, s].astype(jnp.float32)
            seq_ref[pl.ds(b * SPS + s, 1), :] = tok_ref[tid] * m

    # ------- merged Conv1d branches + (bias, ReLU) + max-pool over time --------
    # Both batches share one (ACC_ROWS, HB) slab; each tap is a single 2-D matmul.
    acc = jnp.dot(seq_ref[pl.ds(0, ACC_ROWS), :], convw_ref[0],
                  preferred_element_type=jnp.float32)
    for t in range(1, KMAX):                     # static unroll over kernel taps
        acc = acc + jnp.dot(seq_ref[pl.ds(t, ACC_ROWS), :], convw_ref[t],
                            preferred_element_type=jnp.float32)
    # precomputed additive 0 / -1e30 validity mask (per-position, per-filter-group)
    acc = acc + convmask_ref[...]
    pooled = jnp.concatenate(
        [jnp.max(acc[b * SPS:(b + 1) * SPS, :], axis=0, keepdims=True)
         for b in range(B)], axis=0)             # (B, F3)
    # (max commutes with the monotone bias-add + ReLU)
    cnn = jnp.maximum(pooled + bias(OFF_CONVB, F3), 0.0)          # (B, F3)

    # --------- 2-layer bidirectional LSTM over a length-1 sequence -------------
    # Packed gate columns: [i_f i_b | o_f o_b | g_f g_b].  Zero initial state =>
    # forget-gate term is exactly 0, so its columns are not stored or computed.
    def bilstm(xin, wmat, bvec):
        gates = jnp.dot(xin, wmat, preferred_element_type=jnp.float32) + bvec
        sig = jax.nn.sigmoid(gates[:, :4 * H])   # i|o together: one 128-lane vreg
        g = jnp.tanh(gates[:, 4 * H:6 * H])      # g block (aligned trailing 64 lanes)
        c = sig[:, :2 * H] * g                   # c = i * g
        return sig[:, 2 * H:4 * H] * jnp.tanh(c)  # h = o*tanh(c) = [h_fwd | h_bwd]

    w0 = lstmw_ref[ROW_W0:ROW_W0 + F3, :]        # (48, 192)
    w1 = lstmw_ref[ROW_W1:ROW_W1 + 2 * H, :]     # (64, 192)
    h0 = bilstm(cnn, w0, bias(OFF_B0, G6))       # inter-layer dropout = identity
    lstm_out = bilstm(h0, w1, bias(OFF_B1, G6))  # (B, 2H)

    # Attention over a length-1 sequence: softmax == 1 exactly -> attended == lstm_out.
    attended = lstm_out

    # ----------------------------- feature branch ------------------------------
    featf = feat_ref[...]                        # (B, FEAT_DIM)
    feat = featf[:, :FEAT_DIM - 1]
    wf1 = headw_ref[ROW_WF1:ROW_WF1 + FEAT_DIM - 1, :]
    wf2 = headw_ref[ROW_WF2:ROW_WF2 + H, :]
    ph = jnp.maximum(jnp.dot(feat, wf1, preferred_element_type=jnp.float32)
                     + bias(OFF_BF1, H), 0.0)
    pf = jnp.dot(ph, wf2, preferred_element_type=jnp.float32) + bias(OFF_BF2, H)

    # language embedding via one-hot matmul (gather-free); round before int cast
    lang = jnp.floor(featf[:, FEAT_DIM - 1:FEAT_DIM] + 0.5).astype(jnp.int32)
    onehot = (lang == jax.lax.broadcasted_iota(jnp.int32, (B, NUM_LANG), 1)
              ).astype(jnp.float32)
    emb = headw_ref[ROW_EMB:ROW_EMB + NUM_LANG, :]
    lemb = jnp.dot(onehot, emb, preferred_element_type=jnp.float32)   # (B, H)

    # --------------- classifier (concat-free via row-split weight) -------------
    wc1_a = headw_ref[ROW_WC1:ROW_WC1 + 2 * H, :]            # attended part
    wc1_b = headw_ref[ROW_WC1 + 2 * H:ROW_WC1 + 3 * H, :]    # feature part
    wc1_c = headw_ref[ROW_WC1 + 3 * H:ROW_WC1 + 4 * H, :]    # lang-emb part
    hc = jnp.dot(attended, wc1_a, preferred_element_type=jnp.float32)
    hc = hc + jnp.dot(pf, wc1_b, preferred_element_type=jnp.float32)
    hc = hc + jnp.dot(lemb, wc1_c, preferred_element_type=jnp.float32)
    hc = jnp.maximum(hc + bias(OFF_BC1, H), 0.0)

    wc2 = headw_ref[ROW_WC2:ROW_WC2 + H, :]                  # cols >= NUM_CLASSES zero
    out_ref[...] = (jnp.dot(hc, wc2, preferred_element_type=jnp.float32)
                    + bias(OFF_BC2, H))                      # full-H lane-dense store


# ------------------------------ parameter init ------------------------------
def init_params(key):
    ks = iter(jax.random.split(key, 32))
    sc = 0.1

    def rnd(shape):
        return jax.random.normal(next(ks), shape, jnp.float32) * sc

    p = {}
    # BERT stand-in token embedding table (3-D so dynamic row index is on a leading dim)
    p["tok_emb"] = rnd((VOCAB, 1, HB))

    # ---- conv: per-size (k, HB, NF), zero-pad taps to KMAX, stack along F ----
    blocks = []
    for k in FILTER_SIZES:
        wk = rnd((k, HB, NF))
        blocks.append(jnp.pad(wk, ((0, KMAX - k), (0, 0), (0, 0))))
    p["conv_w"] = jnp.concatenate(blocks, axis=2)              # (KMAX, HB, F3)
    conv_b = jnp.concatenate([rnd((1, NF)) for _ in FILTER_SIZES], axis=1)

    # ---- static conv position-validity mask (additive 0 / -1e30) ----
    pos = jnp.arange(ACC_ROWS, dtype=jnp.int32) % SPS          # (ACC_ROWS,)
    klen = jnp.array(FILTER_SIZES, jnp.int32)[jnp.arange(F3) // NF]
    valid = pos[:, None] <= (S - klen)[None, :]
    p["conv_mask"] = jnp.where(valid, 0.0, -1e30).astype(jnp.float32)

    # ---- LSTM: per-direction W_ih^T (in, 4H), PyTorch gate order [i|f|g|o];
    #      combined bias (b_ih + b_hh); forget gate dropped (zero init state);
    #      packed as [i_f i_b | o_f o_b | g_f g_b] ----
    def pack_bidir(wf, bf, wb, bb):
        def gsel(m, gi):
            return m[:, gi * H:(gi + 1) * H]
        order = (0, 3, 2)                                      # i, o, g
        w = jnp.concatenate([x for gi in order for x in (gsel(wf, gi), gsel(wb, gi))],
                            axis=1)
        bv = jnp.concatenate([x for gi in order for x in (gsel(bf, gi), gsel(bb, gi))],
                             axis=1)
        return w, bv

    w0, b0 = pack_bidir(rnd((F3, 4 * H)), rnd((1, 4 * H)),
                        rnd((F3, 4 * H)), rnd((1, 4 * H)))
    w1, b1 = pack_bidir(rnd((2 * H, 4 * H)), rnd((1, 4 * H)),
                        rnd((2 * H, 4 * H)), rnd((1, 4 * H)))
    p["lstm_w"] = jnp.concatenate([w0, w1], axis=0)            # (112, 192)

    # ---- head weights: one row-packed slab (HEADW_ROWS, H) ----
    wf1 = rnd((FEAT_DIM - 1, H))
    wf2 = rnd((H, H))
    emb = rnd((NUM_LANG, H))
    # NOTE: attention MLP params are omitted — dead for a length-1 sequence.
    wc1 = rnd((4 * H, H))            # classifier sized to the real 4H input (see TODO)
    wc2 = rnd((H, NUM_CLASSES))
    head = jnp.zeros((HEADW_ROWS, H), jnp.float32)
    head = head.at[ROW_WF1:ROW_WF1 + FEAT_DIM - 1].set(wf1)
    head = head.at[ROW_WF2:ROW_WF2 + H].set(wf2)
    head = head.at[ROW_EMB:ROW_EMB + NUM_LANG].set(emb)
    head = head.at[ROW_WC1:ROW_WC1 + 4 * H].set(wc1)
    head = head.at[ROW_WC2:ROW_WC2 + H, :NUM_CLASSES].set(wc2)
    p["head_w"] = head

    # ---- biases: one lane-packed slab (1, BIAS_LEN) ----
    bf1, bf2, bc1 = rnd((1, H)), rnd((1, H)), rnd((1, H))
    bc2 = rnd((1, NUM_CLASSES))
    bias = jnp.zeros((1, BIAS_LEN), jnp.float32)
    bias = bias.at[:, OFF_CONVB:OFF_CONVB + F3].set(conv_b)
    bias = bias.at[:, OFF_B0:OFF_B0 + G6].set(b0)
    bias = bias.at[:, OFF_B1:OFF_B1 + G6].set(b1)
    bias = bias.at[:, OFF_BF1:OFF_BF1 + H].set(bf1)
    bias = bias.at[:, OFF_BF2:OFF_BF2 + H].set(bf2)
    bias = bias.at[:, OFF_BC1:OFF_BC1 + H].set(bc1)
    bias = bias.at[:, OFF_BC2:OFF_BC2 + NUM_CLASSES].set(bc2)
    p["bias"] = bias
    return p


# -------------------------------- forward ----------------------------------
@jax.jit
def hybrid_forward(params, input_ids, attention_mask, features):
    out = pl.pallas_call(
        _fused_hybrid_kernel,
        out_shape=jax.ShapeDtypeStruct((features.shape[0], H), jnp.float32),
        in_specs=[SMEM_SPEC, SMEM_SPEC] + [VMEM_SPEC] * 7,
        out_specs=VMEM_SPEC,
        scratch_shapes=[pltpu.VMEM((SEQ_ROWS, HB), jnp.float32)],
    )(input_ids, attention_mask, features,
      params["tok_emb"], params["conv_w"], params["conv_mask"],
      params["lstm_w"], params["head_w"], params["bias"])
    return out[:, :NUM_CLASSES]       # wc2/bias columns >= NUM_CLASSES are zero


# ---------------------------------- main ------------------------------------
if __name__ == "__main__":
    key = jax.random.PRNGKey(0)
    k_param, k_ids, k_feat, k_lang = jax.random.split(key, 4)

    params = init_params(k_param)

    input_ids = jax.random.randint(k_ids, (B, S), 0, VOCAB, dtype=jnp.int32)
    attention_mask = jnp.ones((B, S), dtype=jnp.int32)
    feat_cont = jax.random.normal(k_feat, (B, FEAT_DIM - 1), jnp.float32)
    lang_col = jax.random.randint(k_lang, (B, 1), 0, NUM_LANG).astype(jnp.float32)
    features = jnp.concatenate([feat_cont, lang_col], axis=1)   # (B, FEAT_DIM)

    logits = hybrid_forward(params, input_ids, attention_mask, features)
    logits = jax.block_until_ready(logits)
    assert logits.shape == (B, NUM_CLASSES)
    assert bool(jnp.all(jnp.isfinite(logits)))
    print("KERNEL_OK")
</pallas_src>

<mosaic_0001>
module attributes {stable_mosaic.version = 11 : i64} {
  func.func @_fused_hybrid_kernel(%arg0: memref<2x16xi32, #tpu.memory_space<smem>>, %arg1: memref<2x16xi32, #tpu.memory_space<smem>>, %arg2: memref<2x7xf32, #tpu.memory_space<vmem>>, %arg3: memref<50x1x32xf32, #tpu.memory_space<vmem>>, %arg4: memref<5x32x48xf32, #tpu.memory_space<vmem>>, %arg5: memref<32x48xf32, #tpu.memory_space<vmem>>, %arg6: memref<112x192xf32, #tpu.memory_space<vmem>>, %arg7: memref<208x32xf32, #tpu.memory_space<vmem>>, %arg8: memref<1x1152xf32, #tpu.memory_space<vmem>>, %arg9: memref<2x32xf32, #tpu.memory_space<vmem>>, %arg10: memref<40x32xf32, #tpu.memory_space<vmem>>) attributes {dimension_semantics = [], scalar_prefetch = 0 : i64, scratch_operands = 1 : i64, tpu.core_type = #tpu.core_type<tc>} {
    %cst = arith.constant 0.000000e+00 : f32
    %0 = vector.broadcast %cst : f32 to vector<40x32xf32>
    %c0 = arith.constant 0 : index
    %c0_0 = arith.constant 0 : index
    %1 = vector.load %arg10[%c0, %c0_0] : memref<40x32xf32, #tpu.memory_space<vmem>>, vector<40x32xf32>
    tpu.vector_store %arg10[%c0, %c0_0], %0 {strides = array<i32>} : memref<40x32xf32, #tpu.memory_space<vmem>>, vector<40x32xf32>,
    %c0_1 = arith.constant 0 : index
    %c0_2 = arith.constant 0 : index
    %2 = memref.load %arg0[%c0_1, %c0_2] : memref<2x16xi32, #tpu.memory_space<smem>>
    %c0_3 = arith.constant 0 : index
    %c0_4 = arith.constant 0 : index
    %3 = memref.load %arg1[%c0_3, %c0_4] : memref<2x16xi32, #tpu.memory_space<smem>>
    %4 = arith.sitofp %3 : i32 to f32
    %5 = arith.index_cast %2 : i32 to index
    %c0_5 = arith.constant 0 : index
    %c0_6 = arith.constant 0 : index
    %6 = vector.load %arg3[%5, %c0_5, %c0_6] : memref<50x1x32xf32, #tpu.memory_space<vmem>>, vector<1x1x32xf32>
    %7 = vector.shape_cast %6 : vector<1x1x32xf32> to vector<1x32xf32>
    %8 = vector.broadcast %4 : f32 to vector<1x32xf32>
    %9 = arith.mulf %7, %8 : vector<1x32xf32>
    %c0_7 = arith.constant 0 : index
    %c0_8 = arith.constant 0 : index
    %10 = vector.load %arg10[%c0_7, %c0_8] : memref<40x32xf32, #tpu.memory_space<vmem>>, vector<1x32xf32>
    tpu.vector_store %arg10[%c0_7, %c0_8], %9 {strides = array<i32>} : memref<40x32xf32, #tpu.memory_space<vmem>>, vector<1x32xf32>,
    %c0_9 = arith.constant 0 : index
    %c1 = arith.constant 1 : index
    %11 = memref.load %arg0[%c0_9, %c1] : memref<2x16xi32, #tpu.memory_space<smem>>
    %c0_10 = arith.constant 0 : index
    %c1_11 = arith.constant 1 : index
    %12 = memref.load %arg1[%c0_10, %c1_11] : memref<2x16xi32, #tpu.memory_space<smem>>
    %13 = arith.sitofp %12 : i32 to f32
    %14 = arith.index_cast %11 : i32 to index
    %c0_12 = arith.constant 0 : index
    %c0_13 = arith.constant 0 : index
    %15 = vector.load %arg3[%14, %c0_12, %c0_13] : memref<50x1x32xf32, #tpu.memory_space<vmem>>, vector<1x1x32xf32>
    %16 = vector.shape_cast %15 : vector<1x1x32xf32> to vector<1x32xf32>
    %17 = vector.broadcast %13 : f32 to vector<1x32xf32>
    %18 = arith.mulf %16, %17 : vector<1x32xf32>
    %c1_14 = arith.constant 1 : index
    %c0_15 = arith.constant 0 : index
    %19 = vector.load %arg10[%c1_14, %c0_15] : memref<40x32xf32, #tpu.memory_space<vmem>>, vector<1x32xf32>
    tpu.vector_store %arg10[%c1_14, %c0_15], %18 {strides = array<i32>} : memref<40x32xf32, #tpu.memory_space<vmem>>, vector<1x32xf32>,
    %c0_16 = arith.constant 0 : index
    %c2 = arith.constant 2 : index
    %20 = memref.load %arg0[%c0_16, %c2] : memref<2x16xi32, #tpu.memory_space<smem>>
    %c0_17 = arith.constant 0 : index
    %c2_18 = arith.constant 2 : index
    %21 = memref.load %arg1[%c0_17, %c2_18] : memref<2x16xi32, #tpu.memory_space<smem>>
    %22 = arith.sitofp %21 : i32 to f32
    %23 = arith.index_cast %20 : i32 to index
    %c0_19 = arith.constant 0 : index
    %c0_20 = arith.constant 0 : index
    %24 = vector.load %arg3[%23, %c0_19, %c0_20] : memref<50x1x32xf32, #tpu.memory_space<vmem>>, vector<1x1x32xf32>
    %25 = vector.shape_cast %24 : vector<1x1x32xf32> to vector<1x32xf32>
    %26 = vector.broadcast %22 : f32 to vector<1x32xf32>
    %27 = arith.mulf %25, %26 : vector<1x32xf32>
    %c2_21 = arith.constant 2 : index
    %c0_22 = arith.constant 0 : index
    %28 = vector.load %arg10[%c2_21, %c0_22] : memref<40x32xf32, #tpu.memory_space<vmem>>, vector<1x32xf32>
    tpu.vector_store %arg10[%c2_21, %c0_22], %27 {strides = array<i32>} : memref<40x32xf32, #tpu.memory_space<vmem>>, vector<1x32xf32>,
    %c0_23 = arith.constant 0 : index
    %c3 = arith.constant 3 : index
    %29 = memref.load %arg0[%c0_23, %c3] : memref<2x16xi32, #tpu.memory_space<smem>>
    %c0_24 = arith.constant 0 : index
    %c3_25 = arith.constant 3 : index
    %30 = memref.load %arg1[%c0_24, %c3_25] : memref<2x16xi32, #tpu.memory_space<smem>>
    %31 = arith.sitofp %30 : i32 to f32
    %32 = arith.index_cast %29 : i32 to index
    %c0_26 = arith.constant 0 : index
    %c0_27 = arith.constant 0 : index
    %33 = vector.load %arg3[%32, %c0_26, %c0_27] : memref<50x1x32xf32, #tpu.memory_space<vmem>>, vector<1x1x32xf32>
    %34 = vector.shape_cast %33 : vector<1x1x32xf32> to vector<1x32xf32>
    %35 = vector.broadcast %31 : f32 to vector<1x32xf32>
    %36 = arith.mulf %34, %35 : vector<1x32xf32>
    %c3_28 = arith.constant 3 : index
    %c0_29 = arith.constant 0 : index
    %37 = vector.load %arg10[%c3_28, %c0_29] : memref<40x32xf32, #tpu.memory_space<vmem>>, vector<1x32xf32>
    tpu.vector_store %arg10[%c3_28, %c0_29], %36 {strides = array<i32>} : memref<40x32xf32, #tpu.memory_space<vmem>>, vector<1x32xf32>,
    %c0_30 = arith.constant 0 : index
    %c4 = arith.constant 4 : index
    %38 = memref.load %arg0[%c0_30, %c4] : memref<2x16xi32, #tpu.memory_space<smem>>
    %c0_31 = arith.constant 0 : index
    %c4_32 = arith.constant 4 : index
    %39 = memref.load %arg1[%c0_31, %c4_32] : memref<2x16xi32, #tpu.memory_space<smem>>
    %40 = arith.sitofp %39 : i32 to f32
    %41 = arith.index_cast %38 : i32 to index
    %c0_33 = arith.constant 0 : index
    %c0_34 = arith.constant 0 : index
    %42 = vector.load %arg3[%41, %c0_33, %c0_34] : memref<50x1x32xf32, #tpu.memory_space<vmem>>, vector<1x1x32xf32>
    %43 = vector.shape_cast %42 : vector<1x1x32xf32> to vector<1x32xf32>
    %44 = vector.broadcast %40 : f32 to vector<1x32xf32>
    %45 = arith.mulf %43, %44 : vector<1x32xf32>
    %c4_35 = arith.constant 4 : index
    %c0_36 = arith.constant 0 : index
    %46 = vector.load %arg10[%c4_35, %c0_36] : memref<40x32xf32, #tpu.memory_space<vmem>>, vector<1x32xf32>
    tpu.vector_store %arg10[%c4_35, %c0_36], %45 {strides = array<i32>} : memref<40x32xf32, #tpu.memory_space<vmem>>, vector<1x32xf32>,
    %c0_37 = arith.constant 0 : index
    %c5 = arith.constant 5 : index
    %47 = memref.load %arg0[%c0_37, %c5] : memref<2x16xi32, #tpu.memory_space<smem>>
    %c0_38 = arith.constant 0 : index
    %c5_39 = arith.constant 5 : index
    %48 = memref.load %arg1[%c0_38, %c5_39] : memref<2x16xi32, #tpu.memory_space<smem>>
    %49 = arith.sitofp %48 : i32 to f32
    %50 = arith.index_cast %47 : i32 to index
    %c0_40 = arith.constant 0 : index
    %c0_41 = arith.constant 0 : index
    %51 = vector.load %arg3[%50, %c0_40, %c0_41] : memref<50x1x32xf32, #tpu.memory_space<vmem>>, vector<1x1x32xf32>
    %52 = vector.shape_cast %51 : vector<1x1x32xf32> to vector<1x32xf32>
    %53 = vector.broadcast %49 : f32 to vector<1x32xf32>
    %54 = arith.mulf %52, %53 : vector<1x32xf32>
    %c5_42 = arith.constant 5 : index
    %c0_43 = arith.constant 0 : index
    %55 = vector.load %arg10[%c5_42, %c0_43] : memref<40x32xf32, #tpu.memory_space<vmem>>, vector<1x32xf32>
    tpu.vector_store %arg10[%c5_42, %c0_43], %54 {strides = array<i32>} : memref<40x32xf32, #tpu.memory_space<vmem>>, vector<1x32xf32>,
    %c0_44 = arith.constant 0 : index
    %c6 = arith.constant 6 : index
    %56 = memref.load %arg0[%c0_44, %c6] : memref<2x16xi32, #tpu.memory_space<smem>>
    %c0_45 = arith.constant 0 : index
    %c6_46 = arith.constant 6 : index
    %57 = memref.load %arg1[%c0_45, %c6_46] : memref<2x16xi32, #tpu.memory_space<smem>>
    %58 = arith.sitofp %57 : i32 to f32
    %59 = arith.index_cast %56 : i32 to index
    %c0_47 = arith.constant 0 : index
    %c0_48 = arith.constant 0 : index
    %60 = vector.load %arg3[%59, %c0_47, %c0_48] : memref<50x1x32xf32, #tpu.memory_space<vmem>>, vector<1x1x32xf32>
    %61 = vector.shape_cast %60 : vector<1x1x32xf32> to vector<1x32xf32>
    %62 = vector.broadcast %58 : f32 to vector<1x32xf32>
    %63 = arith.mulf %61, %62 : vector<1x32xf32>
    %c6_49 = arith.constant 6 : index
    %c0_50 = arith.constant 0 : index
    %64 = vector.load %arg10[%c6_49, %c0_50] : memref<40x32xf32, #tpu.memory_space<vmem>>, vector<1x32xf32>
    tpu.vector_store %arg10[%c6_49, %c0_50], %63 {strides = array<i32>} : memref<40x32xf32, #tpu.memory_space<vmem>>, vector<1x32xf32>,
    %c0_51 = arith.constant 0 : index
    %c7 = arith.constant 7 : index
    %65 = memref.load %arg0[%c0_51, %c7] : memref<2x16xi32, #tpu.memory_space<smem>>
    %c0_52 = arith.constant 0 : index
    %c7_53 = arith.constant 7 : index
    %66 = memref.load %arg1[%c0_52, %c7_53] : memref<2x16xi32, #tpu.memory_space<smem>>
    %67 = arith.sitofp %66 : i32 to f32
    %68 = arith.index_cast %65 : i32 to index
    %c0_54 = arith.constant 0 : index
    %c0_55 = arith.constant 0 : index
    %69 = vector.load %arg3[%68, %c0_54, %c0_55] : memref<50x1x32xf32, #tpu.memory_space<vmem>>, vector<1x1x32xf32>
    %70 = vector.shape_cast %69 : vector<1x1x32xf32> to vector<1x32xf32>
    %71 = vector.broadcast %67 : f32 to vector<1x32xf32>
    %72 = arith.mulf %70, %71 : vector<1x32xf32>
    %c7_56 = arith.constant 7 : index
    %c0_57 = arith.constant 0 : index
    %73 = vector.load %arg10[%c7_56, %c0_57] : memref<40x32xf32, #tpu.memory_space<vmem>>, vector<1x32xf32>
    tpu.vector_store %arg10[%c7_56, %c0_57], %72 {strides = array<i32>} : memref<40x32xf32, #tpu.memory_space<vmem>>, vector<1x32xf32>,
    %c0_58 = arith.constant 0 : index
    %c8 = arith.constant 8 : index
    %74 = memref.load %arg0[%c0_58, %c8] : memref<2x16xi32, #tpu.memory_space<smem>>
    %c0_59 = arith.constant 0 : index
    %c8_60 = arith.constant 8 : index
    %75 = memref.load %arg1[%c0_59, %c8_60] : memref<2x16xi32, #tpu.memory_space<smem>>
    %76 = arith.sitofp %75 : i32 to f32
    %77 = arith.index_cast %74 : i32 to index
    %c0_61 = arith.constant 0 : index
    %c0_62 = arith.constant 0 : index
    %78 = vector.load %arg3[%77, %c0_61, %c0_62] : memref<50x1x32xf32, #tpu.memory_space<vmem>>, vector<1x1x32xf32>
    %79 = vector.shape_cast %78 : vector<1x1x32xf32> to vector<1x32xf32>
    %80 = vector.broadcast %76 : f32 to vector<1x32xf32>
    %81 = arith.mulf %79, %80 : vector<1x32xf32>
    %c8_63 = arith.constant 8 : index
    %c0_64 = arith.constant 0 : index
    %82 = vector.load %arg10[%c8_63, %c0_64] : memref<40x32xf32, #tpu.memory_space<vmem>>, vector<1x32xf32>
    tpu.vector_store %arg10[%c8_63, %c0_64], %81 {strides = array<i32>} : memref<40x32xf32, #tpu.memory_space<vmem>>, vector<1x32xf32>,
    %c0_65 = arith.constant 0 : index
    %c9 = arith.constant 9 : index
    %83 = memref.load %arg0[%c0_65, %c9] : memref<2x16xi32, #tpu.memory_space<smem>>
    %c0_66 = arith.constant 0 : index
    %c9_67 = arith.constant 9 : index
    %84 = memref.load %arg1[%c0_66, %c9_67] : memref<2x16xi32, #tpu.memory_space<smem>>
    %85 = arith.sitofp %84 : i32 to f32
    %86 = arith.index_cast %83 : i32 to index
    %c0_68 = arith.constant 0 : index
    %c0_69 = arith.constant 0 : index
    %87 = vector.load %arg3[%86, %c0_68, %c0_69] : memref<50x1x32xf32, #tpu.memory_space<vmem>>, vector<1x1x32xf32>
    %88 = vector.shape_cast %87 : vector<1x1x32xf32> to vector<1x32xf32>
    %89 = vector.broadcast %85 : f32 to vector<1x32xf32>
    %90 = arith.mulf %88, %89 : vector<1x32xf32>
    %c9_70 = arith.constant 9 : index
    %c0_71 = arith.constant 0 : index
    %91 = vector.load %arg10[%c9_70, %c0_71] : memref<40x32xf32, #tpu.memory_space<vmem>>, vector<1x32xf32>
    tpu.vector_store %arg10[%c9_70, %c0_71], %90 {strides = array<i32>} : memref<40x32xf32, #tpu.memory_space<vmem>>, vector<1x32xf32>,
    %c0_72 = arith.constant 0 : index
    %c10 = arith.constant 10 : index
    %92 = memref.load %arg0[%c0_72, %c10] : memref<2x16xi32, #tpu.memory_space<smem>>
    %c0_73 = arith.constant 0 : index
    %c10_74 = arith.constant 10 : index
    %93 = memref.load %arg1[%c0_73, %c10_74] : memref<2x16xi32, #tpu.memory_space<smem>>
    %94 = arith.sitofp %93 : i32 to f32
    %95 = arith.index_cast %92 : i32 to index
    %c0_75 = arith.constant 0 : index
    %c0_76 = arith.constant 0 : index
    %96 = vector.load %arg3[%95, %c0_75, %c0_76] : memref<50x1x32xf32, #tpu.memory_space<vmem>>, vector<1x1x32xf32>
    %97 = vector.shape_cast %96 : vector<1x1x32xf32> to vector<1x32xf32>
    %98 = vector.broadcast %94 : f32 to vector<1x32xf32>
    %99 = arith.mulf %97, %98 : vector<1x32xf32>
    %c10_77 = arith.constant 10 : index
    %c0_78 = arith.constant 0 : index
    %100 = vector.load %arg10[%c10_77, %c0_78] : memref<40x32xf32, #tpu.memory_space<vmem>>, vector<1x32xf32>
    tpu.vector_store %arg10[%c10_77, %c0_78], %99 {strides = array<i32>} : memref<40x32xf32, #tpu.memory_space<vmem>>, vector<1x32xf32>,
    %c0_79 = arith.constant 0 : index
    %c11 = arith.constant 11 : index
    %101 = memref.load %arg0[%c0_79, %c11] : memref<2x16xi32, #tpu.memory_space<smem>>
    %c0_80 = arith.constant 0 : index
    %c11_81 = arith.constant 11 : index
    %102 = memref.load %arg1[%c0_80, %c11_81] : memref<2x16xi32, #tpu.memory_space<smem>>
    %103 = arith.sitofp %102 : i32 to f32
    %104 = arith.index_cast %101 : i32 to index
    %c0_82 = arith.constant 0 : index
    %c0_83 = arith.constant 0 : index
    %105 = vector.load %arg3[%104, %c0_82, %c0_83] : memref<50x1x32xf32, #tpu.memory_space<vmem>>, vector<1x1x32xf32>
    %106 = vector.shape_cast %105 : vector<1x1x32xf32> to vector<1x32xf32>
    %107 = vector.broadcast %103 : f32 to vector<1x32xf32>
    %108 = arith.mulf %106, %107 : vector<1x32xf32>
    %c11_84 = arith.constant 11 : index
    %c0_85 = arith.constant 0 : index
    %109 = vector.load %arg10[%c11_84, %c0_85] : memref<40x32xf32, #tpu.memory_space<vmem>>, vector<1x32xf32>
    tpu.vector_store %arg10[%c11_84, %c0_85], %108 {strides = array<i32>} : memref<40x32xf32, #tpu.memory_space<vmem>>, vector<1x32xf32>,
    %c0_86 = arith.constant 0 : index
    %c12 = arith.constant 12 : index
    %110 = memref.load %arg0[%c0_86, %c12] : memref<2x16xi32, #tpu.memory_space<smem>>
    %c0_87 = arith.constant 0 : index
    %c12_88 = arith.constant 12 : index
    %111 = memref.load %arg1[%c0_87, %c12_88] : memref<2x16xi32, #tpu.memory_space<smem>>
    %112 = arith.sitofp %111 : i32 to f32
    %113 = arith.index_cast %110 : i32 to index
    %c0_89 = arith.constant 0 : index
    %c0_90 = arith.constant 0 : index
    %114 = vector.load %arg3[%113, %c0_89, %c0_90] : memref<50x1x32xf32, #tpu.memory_space<vmem>>, vector<1x1x32xf32>
    %115 = vector.shape_cast %114 : vector<1x1x32xf32> to vector<1x32xf32>
    %116 = vector.broadcast %112 : f32 to vector<1x32xf32>
    %117 = arith.mulf %115, %116 : vector<1x32xf32>
    %c12_91 = arith.constant 12 : index
    %c0_92 = arith.constant 0 : index
    %118 = vector.load %arg10[%c12_91, %c0_92] : memref<40x32xf32, #tpu.memory_space<vmem>>, vector<1x32xf32>
    tpu.vector_store %arg10[%c12_91, %c0_92], %117 {strides = array<i32>} : memref<40x32xf32, #tpu.memory_space<vmem>>, vector<1x32xf32>,
    %c0_93 = arith.constant 0 : index
    %c13 = arith.constant 13 : index
    %119 = memref.load %arg0[%c0_93, %c13] : memref<2x16xi32, #tpu.memory_space<smem>>
    %c0_94 = arith.constant 0 : index
    %c13_95 = arith.constant 13 : index
    %120 = memref.load %arg1[%c0_94, %c13_95] : memref<2x16xi32, #tpu.memory_space<smem>>
    %121 = arith.sitofp %120 : i32 to f32
    %122 = arith.index_cast %119 : i32 to index
    %c0_96 = arith.constant 0 : index
    %c0_97 = arith.constant 0 : index
    %123 = vector.load %arg3[%122, %c0_96, %c0_97] : memref<50x1x32xf32, #tpu.memory_space<vmem>>, vector<1x1x32xf32>
    %124 = vector.shape_cast %123 : vector<1x1x32xf32> to vector<1x32xf32>
    %125 = vector.broadcast %121 : f32 to vector<1x32xf32>
    %126 = arith.mulf %124, %125 : vector<1x32xf32>
    %c13_98 = arith.constant 13 : index
    %c0_99 = arith.constant 0 : index
    %127 = vector.load %arg10[%c13_98, %c0_99] : memref<40x32xf32, #tpu.memory_space<vmem>>, vector<1x32xf32>
    tpu.vector_store %arg10[%c13_98, %c0_99], %126 {strides = array<i32>} : memref<40x32xf32, #tpu.memory_space<vmem>>, vector<1x32xf32>,
    %c0_100 = arith.constant 0 : index
    %c14 = arith.constant 14 : index
    %128 = memref.load %arg0[%c0_100, %c14] : memref<2x16xi32, #tpu.memory_space<smem>>
    %c0_101 = arith.constant 0 : index
    %c14_102 = arith.constant 14 : index
    %129 = memref.load %arg1[%c0_101, %c14_102] : memref<2x16xi32, #tpu.memory_space<smem>>
    %130 = arith.sitofp %129 : i32 to f32
    %131 = arith.index_cast %128 : i32 to index
    %c0_103 = arith.constant 0 : index
    %c0_104 = arith.constant 0 : index
    %132 = vector.load %arg3[%131, %c0_103, %c0_104] : memref<50x1x32xf32, #tpu.memory_space<vmem>>, vector<1x1x32xf32>
    %133 = vector.shape_cast %132 : vector<1x1x32xf32> to vector<1x32xf32>
    %134 = vector.broadcast %130 : f32 to vector<1x32xf32>
    %135 = arith.mulf %133, %134 : vector<1x32xf32>
    %c14_105 = arith.constant 14 : index
    %c0_106 = arith.constant 0 : index
    %136 = vector.load %arg10[%c14_105, %c0_106] : memref<40x32xf32, #tpu.memory_space<vmem>>, vector<1x32xf32>
    tpu.vector_store %arg10[%c14_105, %c0_106], %135 {strides = array<i32>} : memref<40x32xf32, #tpu.memory_space<vmem>>, vector<1x32xf32>,
    %c0_107 = arith.constant 0 : index
    %c15 = arith.constant 15 : index
    %137 = memref.load %arg0[%c0_107, %c15] : memref<2x16xi32, #tpu.memory_space<smem>>
    %c0_108 = arith.constant 0 : index
    %c15_109 = arith.constant 15 : index
    %138 = memref.load %arg1[%c0_108, %c15_109] : memref<2x16xi32, #tpu.memory_space<smem>>
    %139 = arith.sitofp %138 : i32 to f32
    %140 = arith.index_cast %137 : i32 to index
    %c0_110 = arith.constant 0 : index
    %c0_111 = arith.constant 0 : index
    %141 = vector.load %arg3[%140, %c0_110, %c0_111] : memref<50x1x32xf32, #tpu.memory_space<vmem>>, vector<1x1x32xf32>
    %142 = vector.shape_cast %141 : vector<1x1x32xf32> to vector<1x32xf32>
    %143 = vector.broadcast %139 : f32 to vector<1x32xf32>
    %144 = arith.mulf %142, %143 : vector<1x32xf32>
    %c15_112 = arith.constant 15 : index
    %c0_113 = arith.constant 0 : index
    %145 = vector.load %arg10[%c15_112, %c0_113] : memref<40x32xf32, #tpu.memory_space<vmem>>, vector<1x32xf32>
    tpu.vector_store %arg10[%c15_112, %c0_113], %144 {strides = array<i32>} : memref<40x32xf32, #tpu.memory_space<vmem>>, vector<1x32xf32>,
    %c1_114 = arith.constant 1 : index
    %c0_115 = arith.constant 0 : index
    %146 = memref.load %arg0[%c1_114, %c0_115] : memref<2x16xi32, #tpu.memory_space<smem>>
    %c1_116 = arith.constant 1 : index
    %c0_117 = arith.constant 0 : index
    %147 = memref.load %arg1[%c1_116, %c0_117] : memref<2x16xi32, #tpu.memory_space<smem>>
    %148 = arith.sitofp %147 : i32 to f32
    %149 = arith.index_cast %146 : i32 to index
    %c0_118 = arith.constant 0 : index
    %c0_119 = arith.constant 0 : index
    %150 = vector.load %arg3[%149, %c0_118, %c0_119] : memref<50x1x32xf32, #tpu.memory_space<vmem>>, vector<1x1x32xf32>
    %151 = vector.shape_cast %150 : vector<1x1x32xf32> to vector<1x32xf32>
    %152 = vector.broadcast %148 : f32 to vector<1x32xf32>
    %153 = arith.mulf %151, %152 : vector<1x32xf32>
    %c16 = arith.constant 16 : index
    %c0_120 = arith.constant 0 : index
    %154 = vector.load %arg10[%c16, %c0_120] : memref<40x32xf32, #tpu.memory_space<vmem>>, vector<1x32xf32>
    tpu.vector_store %arg10[%c16, %c0_120], %153 {strides = array<i32>} : memref<40x32xf32, #tpu.memory_space<vmem>>, vector<1x32xf32>,
    %c1_121 = arith.constant 1 : index
    %c1_122 = arith.constant 1 : index
    %155 = memref.load %arg0[%c1_121, %c1_122] : memref<2x16xi32, #tpu.memory_space<smem>>
    %c1_123 = arith.constant 1 : index
    %c1_124 = arith.constant 1 : index
    %156 = memref.load %arg1[%c1_123, %c1_124] : memref<2x16xi32, #tpu.memory_space<smem>>
    %157 = arith.sitofp %156 : i32 to f32
    %158 = arith.index_cast %155 : i32 to index
    %c0_125 = arith.constant 0 : index
    %c0_126 = arith.constant 0 : index
    %159 = vector.load %arg3[%158, %c0_125, %c0_126] : memref<50x1x32xf32, #tpu.memory_space<vmem>>, vector<1x1x32xf32>
    %160 = vector.shape_cast %159 : vector<1x1x32xf32> to vector<1x32xf32>
    %161 = vector.broadcast %157 : f32 to vector<1x32xf32>
    %162 = arith.mulf %160, %161 : vector<1x32xf32>
    %c17 = arith.constant 17 : index
    %c0_127 = arith.constant 0 : index
    %163 = vector.load %arg10[%c17, %c0_127] : memref<40x32xf32, #tpu.memory_space<vmem>>, vector<1x32xf32>
    tpu.vector_store %arg10[%c17, %c0_127], %162 {strides = array<i32>} : memref<40x32xf32, #tpu.memory_space<vmem>>, vector<1x32xf32>,
    %c1_128 = arith.constant 1 : index
    %c2_129 = arith.constant 2 : index
    %164 = memref.load %arg0[%c1_128, %c2_129] : memref<2x16xi32, #tpu.memory_space<smem>>
    %c1_130 = arith.constant 1 : index
    %c2_131 = arith.constant 2 : index
    %165 = memref.load %arg1[%c1_130, %c2_131] : memref<2x16xi32, #tpu.memory_space<smem>>
    %166 = arith.sitofp %165 : i32 to f32
    %167 = arith.index_cast %164 : i32 to index
    %c0_132 = arith.constant 0 : index
    %c0_133 = arith.constant 0 : index
    %168 = vector.load %arg3[%167, %c0_132, %c0_133] : memref<50x1x32xf32, #tpu.memory_space<vmem>>, vector<1x1x32xf32>
    %169 = vector.shape_cast %168 : vector<1x1x32xf32> to vector<1x32xf32>
    %170 = vector.broadcast %166 : f32 to vector<1x32xf32>
    %171 = arith.mulf %169, %170 : vector<1x32xf32>
    %c18 = arith.constant 18 : index
    %c0_134 = arith.constant 0 : index
    %172 = vector.load %arg10[%c18, %c0_134] : memref<40x32xf32, #tpu.memory_space<vmem>>, vector<1x32xf32>
    tpu.vector_store %arg10[%c18, %c0_134], %171 {strides = array<i32>} : memref<40x32xf32, #tpu.memory_space<vmem>>, vector<1x32xf32>,
    %c1_135 = arith.constant 1 : index
    %c3_136 = arith.constant 3 : index
    %173 = memref.load %arg0[%c1_135, %c3_136] : memref<2x16xi32, #tpu.memory_space<smem>>
    %c1_137 = arith.constant 1 : index
    %c3_138 = arith.constant 3 : index
    %174 = memref.load %arg1[%c1_137, %c3_138] : memref<2x16xi32, #tpu.memory_space<smem>>
    %175 = arith.sitofp %174 : i32 to f32
    %176 = arith.index_cast %173 : i32 to index
    %c0_139 = arith.constant 0 : index
    %c0_140 = arith.constant 0 : index
    %177 = vector.load %arg3[%176, %c0_139, %c0_140] : memref<50x1x32xf32, #tpu.memory_space<vmem>>, vector<1x1x32xf32>
    %178 = vector.shape_cast %177 : vector<1x1x32xf32> to vector<1x32xf32>
    %179 = vector.broadcast %175 : f32 to vector<1x32xf32>
    %180 = arith.mulf %178, %179 : vector<1x32xf32>
    %c19 = arith.constant 19 : index
    %c0_141 = arith.constant 0 : index
    %181 = vector.load %arg10[%c19, %c0_141] : memref<40x32xf32, #tpu.memory_space<vmem>>, vector<1x32xf32>
    tpu.vector_store %arg10[%c19, %c0_141], %180 {strides = array<i32>} : memref<40x32xf32, #tpu.memory_space<vmem>>, vector<1x32xf32>,
    %c1_142 = arith.constant 1 : index
    %c4_143 = arith.constant 4 : index
    %182 = memref.load %arg0[%c1_142, %c4_143] : memref<2x16xi32, #tpu.memory_space<smem>>
    %c1_144 = arith.constant 1 : index
    %c4_145 = arith.constant 4 : index
    %183 = memref.load %arg1[%c1_144, %c4_145] : memref<2x16xi32, #tpu.memory_space<smem>>
    %184 = arith.sitofp %183 : i32 to f32
    %185 = arith.index_cast %182 : i32 to index
    %c0_146 = arith.constant 0 : index
    %c0_147 = arith.constant 0 : index
    %186 = vector.load %arg3[%185, %c0_146, %c0_147] : memref<50x1x32xf32, #tpu.memory_space<vmem>>, vector<1x1x32xf32>
    %187 = vector.shape_cast %186 : vector<1x1x32xf32> to vector<1x32xf32>
    %188 = vector.broadcast %184 : f32 to vector<1x32xf32>
    %189 = arith.mulf %187, %188 : vector<1x32xf32>
    %c20 = arith.constant 20 : index
    %c0_148 = arith.constant 0 : index
    %190 = vector.load %arg10[%c20, %c0_148] : memref<40x32xf32, #tpu.memory_space<vmem>>, vector<1x32xf32>
    tpu.vector_store %arg10[%c20, %c0_148], %189 {strides = array<i32>} : memref<40x32xf32, #tpu.memory_space<vmem>>, vector<1x32xf32>,
    %c1_149 = arith.constant 1 : index
    %c5_150 = arith.constant 5 : index
    %191 = memref.load %arg0[%c1_149, %c5_150] : memref<2x16xi32, #tpu.memory_space<smem>>
    %c1_151 = arith.constant 1 : index
    %c5_152 = arith.constant 5 : index
    %192 = memref.load %arg1[%c1_151, %c5_152] : memref<2x16xi32, #tpu.memory_space<smem>>
    %193 = arith.sitofp %192 : i32 to f32
    %194 = arith.index_cast %191 : i32 to index
    %c0_153 = arith.constant 0 : index
    %c0_154 = arith.constant 0 : index
    %195 = vector.load %arg3[%194, %c0_153, %c0_154] : memref<50x1x32xf32, #tpu.memory_space<vmem>>, vector<1x1x32xf32>
    %196 = vector.shape_cast %195 : vector<1x1x32xf32> to vector<1x32xf32>
    %197 = vector.broadcast %193 : f32 to vector<1x32xf32>
    %198 = arith.mulf %196, %197 : vector<1x32xf32>
    %c21 = arith.constant 21 : index
    %c0_155 = arith.constant 0 : index
    %199 = vector.load %arg10[%c21, %c0_155] : memref<40x32xf32, #tpu.memory_space<vmem>>, vector<1x32xf32>
    tpu.vector_store %arg10[%c21, %c0_155], %198 {strides = array<i32>} : memref<40x32xf32, #tpu.memory_space<vmem>>, vector<1x32xf32>,
    %c1_156 = arith.constant 1 : index
    %c6_157 = arith.constant 6 : index
    %200 = memref.load %arg0[%c1_156, %c6_157] : memref<2x16xi32, #tpu.memory_space<smem>>
    %c1_158 = arith.constant 1 : index
    %c6_159 = arith.constant 6 : index
    %201 = memref.load %arg1[%c1_158, %c6_159] : memref<2x16xi32, #tpu.memory_space<smem>>
    %202 = arith.sitofp %201 : i32 to f32
    %203 = arith.index_cast %200 : i32 to index
    %c0_160 = arith.constant 0 : index
    %c0_161 = arith.constant 0 : index
    %204 = vector.load %arg3[%203, %c0_160, %c0_161] : memref<50x1x32xf32, #tpu.memory_space<vmem>>, vector<1x1x32xf32>
    %205 = vector.shape_cast %204 : vector<1x1x32xf32> to vector<1x32xf32>
    %206 = vector.broadcast %202 : f32 to vector<1x32xf32>
    %207 = arith.mulf %205, %206 : vector<1x32xf32>
    %c22 = arith.constant 22 : index
    %c0_162 = arith.constant 0 : index
    %208 = vector.load %arg10[%c22, %c0_162] : memref<40x32xf32, #tpu.memory_space<vmem>>, vector<1x32xf32>
    tpu.vector_store %arg10[%c22, %c0_162], %207 {strides = array<i32>} : memref<40x32xf32, #tpu.memory_space<vmem>>, vector<1x32xf32>,
    %c1_163 = arith.constant 1 : index
    %c7_164 = arith.constant 7 : index
    %209 = memref.load %arg0[%c1_163, %c7_164] : memref<2x16xi32, #tpu.memory_space<smem>>
    %c1_165 = arith.constant 1 : index
    %c7_166 = arith.constant 7 : index
    %210 = memref.load %arg1[%c1_165, %c7_166] : memref<2x16xi32, #tpu.memory_space<smem>>
    %211 = arith.sitofp %210 : i32 to f32
    %212 = arith.index_cast %209 : i32 to index
    %c0_167 = arith.constant 0 : index
    %c0_168 = arith.constant 0 : index
    %213 = vector.load %arg3[%212, %c0_167, %c0_168] : memref<50x1x32xf32, #tpu.memory_space<vmem>>, vector<1x1x32xf32>
    %214 = vector.shape_cast %213 : vector<1x1x32xf32> to vector<1x32xf32>
    %215 = vector.broadcast %211 : f32 to vector<1x32xf32>
    %216 = arith.mulf %214, %215 : vector<1x32xf32>
    %c23 = arith.constant 23 : index
    %c0_169 = arith.constant 0 : index
    %217 = vector.load %arg10[%c23, %c0_169] : memref<40x32xf32, #tpu.memory_space<vmem>>, vector<1x32xf32>
    tpu.vector_store %arg10[%c23, %c0_169], %216 {strides = array<i32>} : memref<40x32xf32, #tpu.memory_space<vmem>>, vector<1x32xf32>,
    %c1_170 = arith.constant 1 : index
    %c8_171 = arith.constant 8 : index
    %218 = memref.load %arg0[%c1_170, %c8_171] : memref<2x16xi32, #tpu.memory_space<smem>>
    %c1_172 = arith.constant 1 : index
    %c8_173 = arith.constant 8 : index
    %219 = memref.load %arg1[%c1_172, %c8_173] : memref<2x16xi32, #tpu.memory_space<smem>>
    %220 = arith.sitofp %219 : i32 to f32
    %221 = arith.index_cast %218 : i32 to index
    %c0_174 = arith.constant 0 : index
    %c0_175 = arith.constant 0 : index
    %222 = vector.load %arg3[%221, %c0_174, %c0_175] : memref<50x1x32xf32, #tpu.memory_space<vmem>>, vector<1x1x32xf32>
    %223 = vector.shape_cast %222 : vector<1x1x32xf32> to vector<1x32xf32>
    %224 = vector.broadcast %220 : f32 to vector<1x32xf32>
    %225 = arith.mulf %223, %224 : vector<1x32xf32>
    %c24 = arith.constant 24 : index
    %c0_176 = arith.constant 0 : index
    %226 = vector.load %arg10[%c24, %c0_176] : memref<40x32xf32, #tpu.memory_space<vmem>>, vector<1x32xf32>
    tpu.vector_store %arg10[%c24, %c0_176], %225 {strides = array<i32>} : memref<40x32xf32, #tpu.memory_space<vmem>>, vector<1x32xf32>,
    %c1_177 = arith.constant 1 : index
    %c9_178 = arith.constant 9 : index
    %227 = memref.load %arg0[%c1_177, %c9_178] : memref<2x16xi32, #tpu.memory_space<smem>>
    %c1_179 = arith.constant 1 : index
    %c9_180 = arith.constant 9 : index
    %228 = memref.load %arg1[%c1_179, %c9_180] : memref<2x16xi32, #tpu.memory_space<smem>>
    %229 = arith.sitofp %228 : i32 to f32
    %230 = arith.index_cast %227 : i32 to index
    %c0_181 = arith.constant 0 : index
    %c0_182 = arith.constant 0 : index
    %231 = vector.load %arg3[%230, %c0_181, %c0_182] : memref<50x1x32xf32, #tpu.memory_space<vmem>>, vector<1x1x32xf32>
    %232 = vector.shape_cast %231 : vector<1x1x32xf32> to vector<1x32xf32>
    %233 = vector.broadcast %229 : f32 to vector<1x32xf32>
    %234 = arith.mulf %232, %233 : vector<1x32xf32>
    %c25 = arith.constant 25 : index
    %c0_183 = arith.constant 0 : index
    %235 = vector.load %arg10[%c25, %c0_183] : memref<40x32xf32, #tpu.memory_space<vmem>>, vector<1x32xf32>
    tpu.vector_store %arg10[%c25, %c0_183], %234 {strides = array<i32>} : memref<40x32xf32, #tpu.memory_space<vmem>>, vector<1x32xf32>,
    %c1_184 = arith.constant 1 : index
    %c10_185 = arith.constant 10 : index
    %236 = memref.load %arg0[%c1_184, %c10_185] : memref<2x16xi32, #tpu.memory_space<smem>>
    %c1_186 = arith.constant 1 : index
    %c10_187 = arith.constant 10 : index
    %237 = memref.load %arg1[%c1_186, %c10_187] : memref<2x16xi32, #tpu.memory_space<smem>>
    %238 = arith.sitofp %237 : i32 to f32
    %239 = arith.index_cast %236 : i32 to index
    %c0_188 = arith.constant 0 : index
    %c0_189 = arith.constant 0 : index
    %240 = vector.load %arg3[%239, %c0_188, %c0_189] : memref<50x1x32xf32, #tpu.memory_space<vmem>>, vector<1x1x32xf32>
    %241 = vector.shape_cast %240 : vector<1x1x32xf32> to vector<1x32xf32>
    %242 = vector.broadcast %238 : f32 to vector<1x32xf32>
    %243 = arith.mulf %241, %242 : vector<1x32xf32>
    %c26 = arith.constant 26 : index
    %c0_190 = arith.constant 0 : index
    %244 = vector.load %arg10[%c26, %c0_190] : memref<40x32xf32, #tpu.memory_space<vmem>>, vector<1x32xf32>
    tpu.vector_store %arg10[%c26, %c0_190], %243 {strides = array<i32>} : memref<40x32xf32, #tpu.memory_space<vmem>>, vector<1x32xf32>,
    %c1_191 = arith.constant 1 : index
    %c11_192 = arith.constant 11 : index
    %245 = memref.load %arg0[%c1_191, %c11_192] : memref<2x16xi32, #tpu.memory_space<smem>>
    %c1_193 = arith.constant 1 : index
    %c11_194 = arith.constant 11 : index
    %246 = memref.load %arg1[%c1_193, %c11_194] : memref<2x16xi32, #tpu.memory_space<smem>>
    %247 = arith.sitofp %246 : i32 to f32
    %248 = arith.index_cast %245 : i32 to index
    %c0_195 = arith.constant 0 : index
    %c0_196 = arith.constant 0 : index
    %249 = vector.load %arg3[%248, %c0_195, %c0_196] : memref<50x1x32xf32, #tpu.memory_space<vmem>>, vector<1x1x32xf32>
    %250 = vector.shape_cast %249 : vector<1x1x32xf32> to vector<1x32xf32>
    %251 = vector.broadcast %247 : f32 to vector<1x32xf32>
    %252 = arith.mulf %250, %251 : vector<1x32xf32>
    %c27 = arith.constant 27 : index
    %c0_197 = arith.constant 0 : index
    %253 = vector.load %arg10[%c27, %c0_197] : memref<40x32xf32, #tpu.memory_space<vmem>>, vector<1x32xf32>
    tpu.vector_store %arg10[%c27, %c0_197], %252 {strides = array<i32>} : memref<40x32xf32, #tpu.memory_space<vmem>>, vector<1x32xf32>,
    %c1_198 = arith.constant 1 : index
    %c12_199 = arith.constant 12 : index
    %254 = memref.load %arg0[%c1_198, %c12_199] : memref<2x16xi32, #tpu.memory_space<smem>>
    %c1_200 = arith.constant 1 : index
    %c12_201 = arith.constant 12 : index
    %255 = memref.load %arg1[%c1_200, %c12_201] : memref<2x16xi32, #tpu.memory_space<smem>>
    %256 = arith.sitofp %255 : i32 to f32
    %257 = arith.index_cast %254 : i32 to index
    %c0_202 = arith.constant 0 : index
    %c0_203 = arith.constant 0 : index
    %258 = vector.load %arg3[%257, %c0_202, %c0_203] : memref<50x1x32xf32, #tpu.memory_space<vmem>>, vector<1x1x32xf32>
    %259 = vector.shape_cast %258 : vector<1x1x32xf32> to vector<1x32xf32>
    %260 = vector.broadcast %256 : f32 to vector<1x32xf32>
    %261 = arith.mulf %259, %260 : vector<1x32xf32>
    %c28 = arith.constant 28 : index
    %c0_204 = arith.constant 0 : index
    %262 = vector.load %arg10[%c28, %c0_204] : memref<40x32xf32, #tpu.memory_space<vmem>>, vector<1x32xf32>
    tpu.vector_store %arg10[%c28, %c0_204], %261 {strides = array<i32>} : memref<40x32xf32, #tpu.memory_space<vmem>>, vector<1x32xf32>,
    %c1_205 = arith.constant 1 : index
    %c13_206 = arith.constant 13 : index
    %263 = memref.load %arg0[%c1_205, %c13_206] : memref<2x16xi32, #tpu.memory_space<smem>>
    %c1_207 = arith.constant 1 : index
    %c13_208 = arith.constant 13 : index
    %264 = memref.load %arg1[%c1_207, %c13_208] : memref<2x16xi32, #tpu.memory_space<smem>>
    %265 = arith.sitofp %264 : i32 to f32
    %266 = arith.index_cast %263 : i32 to index
    %c0_209 = arith.constant 0 : index
    %c0_210 = arith.constant 0 : index
    %267 = vector.load %arg3[%266, %c0_209, %c0_210] : memref<50x1x32xf32, #tpu.memory_space<vmem>>, vector<1x1x32xf32>
    %268 = vector.shape_cast %267 : vector<1x1x32xf32> to vector<1x32xf32>
    %269 = vector.broadcast %265 : f32 to vector<1x32xf32>
    %270 = arith.mulf %268, %269 : vector<1x32xf32>
    %c29 = arith.constant 29 : index
    %c0_211 = arith.constant 0 : index
    %271 = vector.load %arg10[%c29, %c0_211] : memref<40x32xf32, #tpu.memory_space<vmem>>, vector<1x32xf32>
    tpu.vector_store %arg10[%c29, %c0_211], %270 {strides = array<i32>} : memref<40x32xf32, #tpu.memory_space<vmem>>, vector<1x32xf32>,
    %c1_212 = arith.constant 1 : index
    %c14_213 = arith.constant 14 : index
    %272 = memref.load %arg0[%c1_212, %c14_213] : memref<2x16xi32, #tpu.memory_space<smem>>
    %c1_214 = arith.constant 1 : index
    %c14_215 = arith.constant 14 : index
    %273 = memref.load %arg1[%c1_214, %c14_215] : memref<2x16xi32, #tpu.memory_space<smem>>
    %274 = arith.sitofp %273 : i32 to f32
    %275 = arith.index_cast %272 : i32 to index
    %c0_216 = arith.constant 0 : index
    %c0_217 = arith.constant 0 : index
    %276 = vector.load %arg3[%275, %c0_216, %c0_217] : memref<50x1x32xf32, #tpu.memory_space<vmem>>, vector<1x1x32xf32>
    %277 = vector.shape_cast %276 : vector<1x1x32xf32> to vector<1x32xf32>
    %278 = vector.broadcast %274 : f32 to vector<1x32xf32>
    %279 = arith.mulf %277, %278 : vector<1x32xf32>
    %c30 = arith.constant 30 : index
    %c0_218 = arith.constant 0 : index
    %280 = vector.load %arg10[%c30, %c0_218] : memref<40x32xf32, #tpu.memory_space<vmem>>, vector<1x32xf32>
    tpu.vector_store %arg10[%c30, %c0_218], %279 {strides = array<i32>} : memref<40x32xf32, #tpu.memory_space<vmem>>, vector<1x32xf32>,
    %c1_219 = arith.constant 1 : index
    %c15_220 = arith.constant 15 : index
    %281 = memref.load %arg0[%c1_219, %c15_220] : memref<2x16xi32, #tpu.memory_space<smem>>
    %c1_221 = arith.constant 1 : index
    %c15_222 = arith.constant 15 : index
    %282 = memref.load %arg1[%c1_221, %c15_222] : memref<2x16xi32, #tpu.memory_space<smem>>
    %283 = arith.sitofp %282 : i32 to f32
    %284 = arith.index_cast %281 : i32 to index
    %c0_223 = arith.constant 0 : index
    %c0_224 = arith.constant 0 : index
    %285 = vector.load %arg3[%284, %c0_223, %c0_224] : memref<50x1x32xf32, #tpu.memory_space<vmem>>, vector<1x1x32xf32>
    %286 = vector.shape_cast %285 : vector<1x1x32xf32> to vector<1x32xf32>
    %287 = vector.broadcast %283 : f32 to vector<1x32xf32>
    %288 = arith.mulf %286, %287 : vector<1x32xf32>
    %c31 = arith.constant 31 : index
    %c0_225 = arith.constant 0 : index
    %289 = vector.load %arg10[%c31, %c0_225] : memref<40x32xf32, #tpu.memory_space<vmem>>, vector<1x32xf32>
    tpu.vector_store %arg10[%c31, %c0_225], %288 {strides = array<i32>} : memref<40x32xf32, #tpu.memory_space<vmem>>, vector<1x32xf32>,
    %c0_226 = arith.constant 0 : index
    %c0_227 = arith.constant 0 : index
    %290 = vector.load %arg10[%c0_226, %c0_227] : memref<40x32xf32, #tpu.memory_space<vmem>>, vector<32x32xf32>
    %c0_228 = arith.constant 0 : index
    %c0_229 = arith.constant 0 : index
    %c0_230 = arith.constant 0 : index
    %291 = vector.load %arg4[%c0_228, %c0_229, %c0_230] : memref<5x32x48xf32, #tpu.memory_space<vmem>>, vector<1x32x48xf32>
    %292 = vector.shape_cast %291 : vector<1x32x48xf32> to vector<32x48xf32>
    %cst_231 = arith.constant dense<0.000000e+00> : vector<32x48xf32>
    %293 = tpu.matmul %290, %292, %cst_231 {dimension_numbers = #tpu.dot_dimension_numbers<[1], [0], [0], [1], [0, 0, 1, 1], [], []>} : vector<32x32xf32>, vector<32x48xf32>, vector<32x48xf32> -> vector<32x48xf32>
    %c1_232 = arith.constant 1 : index
    %c0_233 = arith.constant 0 : index
    %294 = vector.load %arg10[%c1_232, %c0_233] : memref<40x32xf32, #tpu.memory_space<vmem>>, vector<32x32xf32>
    %c1_234 = arith.constant 1 : index
    %c0_235 = arith.constant 0 : index
    %c0_236 = arith.constant 0 : index
    %295 = vector.load %arg4[%c1_234, %c0_235, %c0_236] : memref<5x32x48xf32, #tpu.memory_space<vmem>>, vector<1x32x48xf32>
    %296 = vector.shape_cast %295 : vector<1x32x48xf32> to vector<32x48xf32>
    %cst_237 = arith.constant dense<0.000000e+00> : vector<32x48xf32>
    %297 = tpu.matmul %294, %296, %cst_237 {dimension_numbers = #tpu.dot_dimension_numbers<[1], [0], [0], [1], [0, 0, 1, 1], [], []>} : vector<32x32xf32>, vector<32x48xf32>, vector<32x48xf32> -> vector<32x48xf32>
    %298 = arith.addf %293, %297 : vector<32x48xf32>
    %c2_238 = arith.constant 2 : index
    %c0_239 = arith.constant 0 : index
    %299 = vector.load %arg10[%c2_238, %c0_239] : memref<40x32xf32, #tpu.memory_space<vmem>>, vector<32x32xf32>
    %c2_240 = arith.constant 2 : index
    %c0_241 = arith.constant 0 : index
    %c0_242 = arith.constant 0 : index
    %300 = vector.load %arg4[%c2_240, %c0_241, %c0_242] : memref<5x32x48xf32, #tpu.memory_space<vmem>>, vector<1x32x48xf32>
    %301 = vector.shape_cast %300 : vector<1x32x48xf32> to vector<32x48xf32>
    %cst_243 = arith.constant dense<0.000000e+00> : vector<32x48xf32>
    %302 = tpu.matmul %299, %301, %cst_243 {dimension_numbers = #tpu.dot_dimension_numbers<[1], [0], [0], [1], [0, 0, 1, 1], [], []>} : vector<32x32xf32>, vector<32x48xf32>, vector<32x48xf32> -> vector<32x48xf32>
    %303 = arith.addf %298, %302 : vector<32x48xf32>
    %c3_244 = arith.constant 3 : index
    %c0_245 = arith.constant 0 : index
    %304 = vector.load %arg10[%c3_244, %c0_245] : memref<40x32xf32, #tpu.memory_space<vmem>>, vector<32x32xf32>
    %c3_246 = arith.constant 3 : index
    %c0_247 = arith.constant 0 : index
    %c0_248 = arith.constant 0 : index
    %305 = vector.load %arg4[%c3_246, %c0_247, %c0_248] : memref<5x32x48xf32, #tpu.memory_space<vmem>>, vector<1x32x48xf32>
    %306 = vector.shape_cast %305 : vector<1x32x48xf32> to vector<32x48xf32>
    %cst_249 = arith.constant dense<0.000000e+00> : vector<32x48xf32>
    %307 = tpu.matmul %304, %306, %cst_249 {dimension_numbers = #tpu.dot_dimension_numbers<[1], [0], [0], [1], [0, 0, 1, 1], [], []>} : vector<32x32xf32>, vector<32x48xf32>, vector<32x48xf32> -> vector<32x48xf32>
    %308 = arith.addf %303, %307 : vector<32x48xf32>
    %c4_250 = arith.constant 4 : index
    %c0_251 = arith.constant 0 : index
    %309 = vector.load %arg10[%c4_250, %c0_251] : memref<40x32xf32, #tpu.memory_space<vmem>>, vector<32x32xf32>
    %c4_252 = arith.constant 4 : index
    %c0_253 = arith.constant 0 : index
    %c0_254 = arith.constant 0 : index
    %310 = vector.load %arg4[%c4_252, %c0_253, %c0_254] : memref<5x32x48xf32, #tpu.memory_space<vmem>>, vector<1x32x48xf32>
    %311 = vector.shape_cast %310 : vector<1x32x48xf32> to vector<32x48xf32>
    %cst_255 = arith.constant dense<0.000000e+00> : vector<32x48xf32>
    %312 = tpu.matmul %309, %311, %cst_255 {dimension_numbers = #tpu.dot_dimension_numbers<[1], [0], [0], [1], [0, 0, 1, 1], [], []>} : vector<32x32xf32>, vector<32x48xf32>, vector<32x48xf32> -> vector<32x48xf32>
    %313 = arith.addf %308, %312 : vector<32x48xf32>
    %c0_256 = arith.constant 0 : index
    %c0_257 = arith.constant 0 : index
    %314 = vector.load %arg5[%c0_256, %c0_257] : memref<32x48xf32, #tpu.memory_space<vmem>>, vector<32x48xf32>
    %315 = arith.addf %313, %314 : vector<32x48xf32>
    %316 = vector.extract_strided_slice %315 {offsets = [0, 0], sizes = [16, 48], strides = [1, 1]} : vector<32x48xf32> to vector<16x48xf32>
    %cst_258 = arith.constant dense<0xFF800000> : vector<48xf32>
    %317 = vector.multi_reduction <maximumf>, %316, %cst_258 [0] : vector<16x48xf32> to vector<48xf32>
    %318 = vector.shape_cast %317 : vector<48xf32> to vector<1x48xf32>
    %319 = vector.extract_strided_slice %315 {offsets = [16, 0], sizes = [16, 48], strides = [1, 1]} : vector<32x48xf32> to vector<16x48xf32>
    %cst_259 = arith.constant dense<0xFF800000> : vector<48xf32>
    %320 = vector.multi_reduction <maximumf>, %319, %cst_259 [0] : vector<16x48xf32> to vector<48xf32>
    %321 = vector.shape_cast %320 : vector<48xf32> to vector<1x48xf32>
    %322 = tpu.concatenate %318, %321 in 0 : vector<1x48xf32>, vector<1x48xf32> -> vector<2x48xf32>
    %c0_260 = arith.constant 0 : index
    %c0_261 = arith.constant 0 : index
    %323 = vector.load %arg8[%c0_260, %c0_261] : memref<1x1152xf32, #tpu.memory_space<vmem>>, vector<1x48xf32>
    %324 = vector.broadcast %323 : vector<1x48xf32> to vector<2x48xf32>
    %325 = arith.addf %322, %324 : vector<2x48xf32>
    %cst_262 = arith.constant 0.000000e+00 : f32
    %326 = vector.broadcast %cst_262 : f32 to vector<2x48xf32>
    %327 = arith.maximumf %325, %326 : vector<2x48xf32>
    %c0_263 = arith.constant 0 : index
    %c0_264 = arith.constant 0 : index
    %328 = vector.load %arg6[%c0_263, %c0_264] : memref<112x192xf32, #tpu.memory_space<vmem>>, vector<48x192xf32>
    %c48 = arith.constant 48 : index
    %c0_265 = arith.constant 0 : index
    %329 = vector.load %arg6[%c48, %c0_265] : memref<112x192xf32, #tpu.memory_space<vmem>>, vector<64x192xf32>
    %c0_266 = arith.constant 0 : index
    %c128 = arith.constant 128 : index
    %330 = vector.load %arg8[%c0_266, %c128] : memref<1x1152xf32, #tpu.memory_space<vmem>>, vector<1x192xf32>
    %cst_267 = arith.constant dense<0.000000e+00> : vector<2x192xf32>
    %331 = tpu.matmul %327, %328, %cst_267 {dimension_numbers = #tpu.dot_dimension_numbers<[1], [0], [0], [1], [0, 0, 1, 1], [], []>} : vector<2x48xf32>, vector<48x192xf32>, vector<2x192xf32> -> vector<2x192xf32>
    %332 = vector.broadcast %330 : vector<1x192xf32> to vector<2x192xf32>
    %333 = arith.addf %331, %332 : vector<2x192xf32>
    %334 = vector.extract_strided_slice %333 {offsets = [0, 0], sizes = [2, 128], strides = [1, 1]} : vector<2x192xf32> to vector<2x128xf32>
    %335 = arith.negf %334 : vector<2x128xf32>
    %336 = math.exp %335 : vector<2x128xf32>
    %cst_268 = arith.constant 1.000000e+00 : f32
    %337 = vector.broadcast %cst_268 : f32 to vector<2x128xf32>
    %338 = arith.addf %337, %336 : vector<2x128xf32>
    %339 = arith.divf %337, %338 : vector<2x128xf32>
    %340 = vector.extract_strided_slice %333 {offsets = [0, 128], sizes = [2, 64], strides = [1, 1]} : vector<2x192xf32> to vector<2x64xf32>
    %341 = math.tanh %340 : vector<2x64xf32>
    %342 = vector.extract_strided_slice %339 {offsets = [0, 0], sizes = [2, 64], strides = [1, 1]} : vector<2x128xf32> to vector<2x64xf32>
    %343 = arith.mulf %342, %341 : vector<2x64xf32>
    %344 = vector.extract_strided_slice %339 {offsets = [0, 64], sizes = [2, 64], strides = [1, 1]} : vector<2x128xf32> to vector<2x64xf32>
    %345 = math.tanh %343 : vector<2x64xf32>
    %346 = arith.mulf %344, %345 : vector<2x64xf32>
    %c0_269 = arith.constant 0 : index
    %c384 = arith.constant 384 : index
    %347 = vector.load %arg8[%c0_269, %c384] : memref<1x1152xf32, #tpu.memory_space<vmem>>, vector<1x192xf32>
    %cst_270 = arith.constant dense<0.000000e+00> : vector<2x192xf32>
    %348 = tpu.matmul %346, %329, %cst_270 {dimension_numbers = #tpu.dot_dimension_numbers<[1], [0], [0], [1], [0, 0, 1, 1], [], []>} : vector<2x64xf32>, vector<64x192xf32>, vector<2x192xf32> -> vector<2x192xf32>
    %349 = vector.broadcast %347 : vector<1x192xf32> to vector<2x192xf32>
    %350 = arith.addf %348, %349 : vector<2x192xf32>
    %351 = vector.extract_strided_slice %350 {offsets = [0, 0], sizes = [2, 128], strides = [1, 1]} : vector<2x192xf32> to vector<2x128xf32>
    %352 = arith.negf %351 : vector<2x128xf32>
    %353 = math.exp %352 : vector<2x128xf32>
    %cst_271 = arith.constant 1.000000e+00 : f32
    %354 = vector.broadcast %cst_271 : f32 to vector<2x128xf32>
    %355 = arith.addf %354, %353 : vector<2x128xf32>
    %356 = arith.divf %354, %355 : vector<2x128xf32>
    %357 = vector.extract_strided_slice %350 {offsets = [0, 128], sizes = [2, 64], strides = [1, 1]} : vector<2x192xf32> to vector<2x64xf32>
    %358 = math.tanh %357 : vector<2x64xf32>
    %359 = vector.extract_strided_slice %356 {offsets = [0, 0], sizes = [2, 64], strides = [1, 1]} : vector<2x128xf32> to vector<2x64xf32>
    %360 = arith.mulf %359, %358 : vector<2x64xf32>
    %361 = vector.extract_strided_slice %356 {offsets = [0, 64], sizes = [2, 64], strides = [1, 1]} : vector<2x128xf32> to vector<2x64xf32>
    %362 = math.tanh %360 : vector<2x64xf32>
    %363 = arith.mulf %361, %362 : vector<2x64xf32>
    %c0_272 = arith.constant 0 : index
    %c0_273 = arith.constant 0 : index
    %364 = vector.load %arg2[%c0_272, %c0_273] : memref<2x7xf32, #tpu.memory_space<vmem>>, vector<2x7xf32>
    %365 = vector.extract_strided_slice %364 {offsets = [0, 0], sizes = [2, 6], strides = [1, 1]} : vector<2x7xf32> to vector<2x6xf32>
    %c0_274 = arith.constant 0 : index
    %c0_275 = arith.constant 0 : index
    %366 = vector.load %arg7[%c0_274, %c0_275] : memref<208x32xf32, #tpu.memory_space<vmem>>, vector<6x32xf32>
    %c8_276 = arith.constant 8 : index
    %c0_277 = arith.constant 0 : index
    %367 = vector.load %arg7[%c8_276, %c0_277] : memref<208x32xf32, #tpu.memory_space<vmem>>, vector<32x32xf32>
    %cst_278 = arith.constant dense<0.000000e+00> : vector<2x32xf32>
    %368 = tpu.matmul %365, %366, %cst_278 {dimension_numbers = #tpu.dot_dimension_numbers<[1], [0], [0], [1], [0, 0, 1, 1], [], []>} : vector<2x6xf32>, vector<6x32xf32>, vector<2x32xf32> -> vector<2x32xf32>
    %c0_279 = arith.constant 0 : index
    %c640 = arith.constant 640 : index
    %369 = vector.load %arg8[%c0_279, %c640] : memref<1x1152xf32, #tpu.memory_space<vmem>>, vector<1x32xf32>
    %370 = vector.broadcast %369 : vector<1x32xf32> to vector<2x32xf32>
    %371 = arith.addf %368, %370 : vector<2x32xf32>
    %cst_280 = arith.constant 0.000000e+00 : f32
    %372 = vector.broadcast %cst_280 : f32 to vector<2x32xf32>
    %373 = arith.maximumf %371, %372 : vector<2x32xf32>
    %cst_281 = arith.constant dense<0.000000e+00> : vector<2x32xf32>
    %374 = tpu.matmul %373, %367, %cst_281 {dimension_numbers = #tpu.dot_dimension_numbers<[1], [0], [0], [1], [0, 0, 1, 1], [], []>} : vector<2x32xf32>, vector<32x32xf32>, vector<2x32xf32> -> vector<2x32xf32>
    %c0_282 = arith.constant 0 : index
    %c768 = arith.constant 768 : index
    %375 = vector.load %arg8[%c0_282, %c768] : memref<1x1152xf32, #tpu.memory_space<vmem>>, vector<1x32xf32>
    %376 = vector.broadcast %375 : vector<1x32xf32> to vector<2x32xf32>
    %377 = arith.addf %374, %376 : vector<2x32xf32>
    %378 = vector.extract_strided_slice %364 {offsets = [0, 6], sizes = [2, 1], strides = [1, 1]} : vector<2x7xf32> to vector<2x1xf32>
    %cst_283 = arith.constant 5.000000e-01 : f32
    %379 = vector.broadcast %cst_283 : f32 to vector<2x1xf32>
    %380 = arith.addf %378, %379 : vector<2x1xf32>
    %381 = math.floor %380 : vector<2x1xf32>
    %382 = arith.fptosi %381 : vector<2x1xf32> to vector<2x1xi32>
    %383 = tpu.iota {dimensions = array<i32: 1>} : vector<2x7xi32>
    %384 = vector.broadcast %382 : vector<2x1xi32> to vector<2x7xi32>
    %385 = arith.cmpi eq, %384, %383 : vector<2x7xi32>
    %386 = arith.extui %385 : vector<2x7xi1> to vector<2x7xi32>
    %387 = arith.sitofp %386 : vector<2x7xi32> to vector<2x7xf32>
    %c40 = arith.constant 40 : index
    %c0_284 = arith.constant 0 : index
    %388 = vector.load %arg7[%c40, %c0_284] : memref<208x32xf32, #tpu.memory_space<vmem>>, vector<7x32xf32>
    %cst_285 = arith.constant dense<0.000000e+00> : vector<2x32xf32>
    %389 = tpu.matmul %387, %388, %cst_285 {dimension_numbers = #tpu.dot_dimension_numbers<[1], [0], [0], [1], [0, 0, 1, 1], [], []>} : vector<2x7xf32>, vector<7x32xf32>, vector<2x32xf32> -> vector<2x32xf32>
    %c48_286 = arith.constant 48 : index
    %c0_287 = arith.constant 0 : index
    %390 = vector.load %arg7[%c48_286, %c0_287] : memref<208x32xf32, #tpu.memory_space<vmem>>, vector<64x32xf32>
    %c112 = arith.constant 112 : index
    %c0_288 = arith.constant 0 : index
    %391 = vector.load %arg7[%c112, %c0_288] : memref<208x32xf32, #tpu.memory_space<vmem>>, vector<32x32xf32>
    %c144 = arith.constant 144 : index
    %c0_289 = arith.constant 0 : index
    %392 = vector.load %arg7[%c144, %c0_289] : memref<208x32xf32, #tpu.memory_space<vmem>>, vector<32x32xf32>
    %cst_290 = arith.constant dense<0.000000e+00> : vector<2x32xf32>
    %393 = tpu.matmul %363, %390, %cst_290 {dimension_numbers = #tpu.dot_dimension_numbers<[1], [0], [0], [1], [0, 0, 1, 1], [], []>} : vector<2x64xf32>, vector<64x32xf32>, vector<2x32xf32> -> vector<2x32xf32>
    %cst_291 = arith.constant dense<0.000000e+00> : vector<2x32xf32>
    %394 = tpu.matmul %377, %391, %cst_291 {dimension_numbers = #tpu.dot_dimension_numbers<[1], [0], [0], [1], [0, 0, 1, 1], [], []>} : vector<2x32xf32>, vector<32x32xf32>, vector<2x32xf32> -> vector<2x32xf32>
    %395 = arith.addf %393, %394 : vector<2x32xf32>
    %cst_292 = arith.constant dense<0.000000e+00> : vector<2x32xf32>
    %396 = tpu.matmul %389, %392, %cst_292 {dimension_numbers = #tpu.dot_dimension_numbers<[1], [0], [0], [1], [0, 0, 1, 1], [], []>} : vector<2x32xf32>, vector<32x32xf32>, vector<2x32xf32> -> vector<2x32xf32>
    %397 = arith.addf %395, %396 : vector<2x32xf32>
    %c0_293 = arith.constant 0 : index
    %c896 = arith.constant 896 : index
    %398 = vector.load %arg8[%c0_293, %c896] : memref<1x1152xf32, #tpu.memory_space<vmem>>, vector<1x32xf32>
    %399 = vector.broadcast %398 : vector<1x32xf32> to vector<2x32xf32>
    %400 = arith.addf %397, %399 : vector<2x32xf32>
    %cst_294 = arith.constant 0.000000e+00 : f32
    %401 = vector.broadcast %cst_294 : f32 to vector<2x32xf32>
    %402 = arith.maximumf %400, %401 : vector<2x32xf32>
    %c176 = arith.constant 176 : index
    %c0_295 = arith.constant 0 : index
    %403 = vector.load %arg7[%c176, %c0_295] : memref<208x32xf32, #tpu.memory_space<vmem>>, vector<32x32xf32>
    %cst_296 = arith.constant dense<0.000000e+00> : vector<2x32xf32>
    %404 = tpu.matmul %402, %403, %cst_296 {dimension_numbers = #tpu.dot_dimension_numbers<[1], [0], [0], [1], [0, 0, 1, 1], [], []>} : vector<2x32xf32>, vector<32x32xf32>, vector<2x32xf32> -> vector<2x32xf32>
    %c0_297 = arith.constant 0 : index
    %c1024 = arith.constant 1024 : index
    %405 = vector.load %arg8[%c0_297, %c1024] : memref<1x1152xf32, #tpu.memory_space<vmem>>, vector<1x32xf32>
    %406 = vector.broadcast %405 : vector<1x32xf32> to vector<2x32xf32>
    %407 = arith.addf %404, %406 : vector<2x32xf32>
    %c0_298 = arith.constant 0 : index
    %c0_299 = arith.constant 0 : index
    %408 = vector.load %arg9[%c0_298, %c0_299] : memref<2x32xf32, #tpu.memory_space<vmem>>, vector<2x32xf32>
    tpu.vector_store %arg9[%c0_298, %c0_299], %407 {strides = array<i32>} : memref<2x32xf32, #tpu.memory_space<vmem>>, vector<2x32xf32>,
    return
  }
}

</mosaic_0001>

<bundles_post_ra>
// kernel: hybrid_forward.1
= control target key start
LH: loop header
LB: loop body
LE: loop exit
PB: predicated region body
PF: predicated region fallthrough
CT: control target
= control target key end

     0   :  { %14 = vsyncpa [#allocation5], 0  ;;  %s1935_s0 = inlined_call_operand.vmem [shape: s32[2,16], index: 0, kind: input, shape index: {}]   ;;  %s1936_s1 = inlined_call_operand.vmem [shape: s32[2,16], index: 1, kind: input, shape index: {}]   ;;  %s1937_s2 = inlined_call_operand.vmem [shape: f32[2,7], index: 2, kind: input, shape index: {}]   ;;  %s1938_s3 = inlined_call_operand.vmem [shape: f32[50,1,32], index: 3, kind: input, shape index: {}]   ;;  %s1939_s4 = inlined_call_operand.vmem [shape: f32[5,32,48], index: 4, kind: input, shape index: {}]   ;;  %s1940_s5 = inlined_call_operand.vmem [shape: f32[32,48], index: 5, kind: input, shape index: {}]   ;;  %s1941_s6 = inlined_call_operand.vmem [shape: f32[112,192], index: 6, kind: input, shape index: {}]   ;;  %s1942_s7 = inlined_call_operand.vmem [shape: f32[208,32], index: 7, kind: input, shape index: {}]   ;;  %s1943_s8 = inlined_call_operand.vmem [shape: f32[1,1152], index: 8, kind: input, shape index: {}]   ;;  %s1944_s9 = inlined_call_operand.hbm [shape: f32[2,32], index: 9, kind: output, shape index: {}]  }
   0x1   :  { %15 = vsyncpa [#allocation7], 0 }
   0x2   :  { %16 = vsyncpa [#allocation4], 0  ;;  %s22_s11 = sshll.u32 %s1935_s0, 4  ;;  %s31_s14 = sshll.u32 %s1936_s1, 4  ;;  %s23_s11 = int_to_ptr.vmem [resolvable:$true] %s22_s11  ;;  %s32_s14 = int_to_ptr.vmem [resolvable:$true] %s31_s14 }
   0x3   :  { %s1286_s15 = smov [#allocation3]   ;;  %s1287_s16 = smov [#allocation6]  }
   0x4   :  { %25 = dma.vmem_to_smem %s23_s11, 32, %s1286_s15, [#allocation5]  }
   0x5   :  { %34 = dma.vmem_to_smem %s32_s14, 32, %s1287_s16, [#allocation7]  }
   0x6   :  { %1280 = dma.done.wait [#allocation5], 32  }
   0x7   :  { %1281 = vsyncadd [#allocation5], 4294967264 }
   0x8   :  { %1282 = dma.done.wait [#allocation7], 32  }
   0x9   :  { %1283 = vsyncadd [#allocation7], 4294967264 }
   0xa   :  { %57 = sfence }
   0xb   :  { %v1148_v0 = vld [vmem:[%s1939_s4 + $0x38] sm:$0xff]  ;;  %vm58_vm0 = vcmask 261120   ;;  %v1147_v3 = vld [vmem:[%s1939_s4 + $0x30] sm:$0xff]  ;;  %v1288_v6 = vmov 0.0   ;;  %s1368_s27 = sld [smem:[#allocation3 + $0x1]]  ;;  %v1146_v7 = vld [vmem:[%s1939_s4 + $0x28] sm:$0xff] }
   0xc   :  { %v328_v1 = vld [vmem:[%s1939_s4 + $0x18] sm:$0xff]  ;;  %362 = vmatpush.msra.mxu0 %v1148_v0  ;;  %1197 = vmatpush.msra.mxu3 %v1148_v0  ;;  %v327_v4 = vld [vmem:[%s1939_s4 + $0x10] sm:$0xff]  ;;  %59 = vst.msk [vmem:[#allocation2] sm:$0xff] %vm58_vm0, %v1288_v6  ;;  %s1375_s30 = sld [smem:[#allocation6 + $0x1]]  ;;  %v326_v8 = vld [vmem:[%s1939_s4 + $0x8] sm:$0xff]  ;;  %vm71_vm1 = vcmask 253952  }
   0xd   :  { %v1160_v2 = vld [vmem:[%s1939_s4 + $0x58] sm:$0xff]  ;;  %v1159_v5 = vld [vmem:[%s1939_s4 + $0x50] sm:$0xff]  ;;  %403 = vmatpush.msra.mxu1 %v328_v1  ;;  %60 = vst.msk [vmem:[#allocation2 + $0x8] sm:$0xff] %vm58_vm0, %v1288_v6  ;;  %v1158_v9 = vld [vmem:[%s1939_s4 + $0x48] sm:$0xff]  ;;  %s1386_s16 = sld [smem:[#allocation3 + $0x2]]  ;;  %vm590_vm2 = vcmask 392192  }
   0xe   :  { %453 = vmatpush.msra.mxu2 %v1160_v2  ;;  %363 = vmatpush.msra.mxu0 %v1147_v3  ;;  %v1145_v10 = vld [vmem:[%s1939_s4 + $0x20] sm:$0xff]  ;;  %61 = vst.msk [vmem:[#allocation2 + $0x10] sm:$0xff] %vm58_vm0, %v1288_v6  ;;  %s1393_s0 = sld [smem:[#allocation6 + $0x2]]  ;;  %v1176_v32 = vld [vmem:[%s1939_s4 + $0x98] sm:$0xff]  ;;  %v1167_v36 = vld [vmem:[%s1939_s4 + $0x70] sm:$0xff]  ;;  %vm609_vm3 = vcmask 1040384  }
   0xf   :  { %1198 = vmatpush.msra.mxu3 %v1147_v3  ;;  %404 = vmatpush.msra.mxu1 %v327_v4  ;;  %v325_v11 = vld [vmem:[%s1939_s4] sm:$0xff]  ;;  %62 = vst.msk [vmem:[#allocation2 + $0x18] sm:$0xff] %vm58_vm0, %v1288_v6  ;;  %s1087_s1 = sld [smem:[#allocation3 + $0x3]]  ;;  %v1168_v33 = vld [vmem:[%s1939_s4 + $0x78] sm:$0xff]  ;;  %v1166_v38 = vld [vmem:[%s1939_s4 + $0x68] sm:$0xff]  ;;  %vm814_vm8 = vcmask 1045504  }
  0x10   :  { %454 = vmatpush.msra.mxu2 %v1159_v5  ;;  %364 = vmatpush.msra.mxu0 %v1146_v7  ;;  %v1157_v12 = vld [vmem:[%s1939_s4 + $0x40] sm:$0xff]  ;;  %63 = vst.msk [vmem:[#allocation2 + $0x20] sm:$0xff] %vm58_vm0, %v1288_v6  ;;  %s1088_s21 = sld [smem:[#allocation6 + $0x3]]  ;;  %v1175_v39 = vld [vmem:[%s1939_s4 + $0x90] sm:$0xff]  ;;  %v1174_v63 = vld [vmem:[%s1939_s4 + $0x88] sm:$0xff]  ;;  %vm810_vm9 = vcmask 48128  }
  0x11   :  { %1199 = vmatpush.msra.mxu3 %v1146_v7  ;;  %405 = vmatpush.msra.mxu1 %v326_v8  ;;  %s76_s24 = scalar_lea.vmem %s1938_s3, %s1368_s27  ;;  %s1089_s25 = sld [smem:[#allocation3 + $0x4]]  ;;  %v1165_v43 = vld [vmem:[%s1939_s4 + $0x60] sm:$0xff]  ;;  %vm730_vm10 = vcmask 523264   ;;  %vm882_vm11 = vcmask 1046528  }
  0x12   :  { %455 = vmatpush.msra.mxu2 %v1158_v9  ;;  %365 = vmatpush.msra.mxu0 %v1145_v10  ;;  %s75_s26 = scvt.s32.f32 %s1375_s30  ;;  %v77_v13 = vld [vmem:[%s76_s24] sm:$0x1]  ;;  %s1090_s28 = sld [smem:[#allocation6 + $0x4]] }
  0x13   :  { %1200 = vmatpush.msra.mxu3 %v1145_v10  ;;  %406 = vmatpush.msra.mxu1 %v325_v11  ;;  %s84_s11 = scalar_lea.vmem %s1938_s3, %s1386_s16  ;;  %s1091_s12 = sld [smem:[#allocation3 + $0x5]] }
  0x14   :  { %456 = vmatpush.msra.mxu2 %v1157_v12  ;;  %v78_v14 = vstv %s75_s26  ;;  %s83_s13 = scvt.s32.f32 %s1393_s0  ;;  %v85_v15 = vld [vmem:[%s84_s11] sm:$0x1]  ;;  %s1092_s14 = sld [smem:[#allocation6 + $0x5]]  ;;  %561 = vmatpush.msrb.mxu0 %v1176_v32 }
  0x15   :  { %v79_v16 = vmul.f32 %v78_v14, %v77_v13  ;;  %s92_s27 = scalar_lea.vmem %s1938_s3, %s1087_s1  ;;  %s1093_s18 = sld [smem:[#allocation3 + $0x6]]  ;;  %507 = vmatpush.msrb.mxu3 %v1168_v33 }
  0x16   :  { %v86_v17 = vstv %s83_s13  ;;  %s91_s30 = scvt.s32.f32 %s1088_s21  ;;  %v93_v18 = vld [vmem:[%s92_s27] sm:$0x1]  ;;  %s1415_s19 = sld [smem:[#allocation6 + $0x6]]  ;;  %562 = vmatpush.msrb.mxu0 %v1175_v39 }
  0x17   :  { %80 = vst.msk [vmem:[#allocation2 + $0x1] sm:$0x1] %vm71_vm1, %v79_v16  ;;  %v87_v19 = vmul.f32 %v86_v17, %v85_v15  ;;  %s100_s0 = scalar_lea.vmem %s1938_s3, %s1089_s25  ;;  %s1095_s22 = sld [smem:[#allocation3 + $0x7]]  ;;  %508 = vmatpush.msrb.mxu3 %v1167_v36 }
  0x18   :  { %v94_v20 = vstv %s91_s30  ;;  %s99_s23 = scvt.s32.f32 %s1090_s28  ;;  %v101_v21 = vld [vmem:[%s100_s0] sm:$0x1]  ;;  %s1421_s24 = sld [smem:[#allocation6 + $0x7]]  ;;  %563 = vmatpush.msrb.mxu0 %v1174_v63 }
  0x19   :  { %88 = vst.msk [vmem:[#allocation2 + $0x2] sm:$0x1] %vm71_vm1, %v87_v19  ;;  %v95_v22 = vmul.f32 %v94_v20, %v93_v18  ;;  %s108_s26 = scalar_lea.vmem %s1938_s3, %s1091_s12  ;;  %s1427_s29 = sld [smem:[#allocation3 + $0x8]]  ;;  %509 = vmatpush.msrb.mxu3 %v1166_v38 }
  0x1a   :  { %v102_v23 = vstv %s99_s23  ;;  %s107_s10 = scvt.s32.f32 %s1092_s14  ;;  %v109_v24 = vld [vmem:[%s108_s26] sm:$0x1]  ;;  %s1429_s25 = sld [smem:[#allocation6 + $0x8]] }
  0x1b   :  { %96 = vst.msk [vmem:[#allocation2 + $0x3] sm:$0x1] %vm71_vm1, %v95_v22  ;;  %v103_v25 = vmul.f32 %v102_v23, %v101_v21  ;;  %s116_s13 = scalar_lea.vmem %s1938_s3, %s1093_s18  ;;  %s1435_s15 = sld [smem:[#allocation3 + $0x89]]  ;;  %510 = vmatpush.msrb.mxu3 %v1165_v43 }
  0x1c   :  { %v110_v26 = vstv %s107_s10  ;;  %s115_s12 = scvt.s32.f32 %s1415_s19  ;;  %v117_v27 = vld [vmem:[%s116_s13] sm:$0x1]  ;;  %s1438_s17 = sld [smem:[#allocation6 + $0x89]] }
  0x1d   :  { %104 = vst.msk [vmem:[#allocation2 + $0x4] sm:$0x1] %vm71_vm1, %v103_v25  ;;  %v111_v28 = vmul.f32 %v110_v26, %v109_v24  ;;  %s124_s30 = scalar_lea.vmem %s1938_s3, %s1095_s22  ;;  %s1444_s16 = sld [smem:[#allocation3 + $0x8a]]  ;;  %v1173_v24 = vld [vmem:[%s1939_s4 + $0x80] sm:$0xff] }
  0x1e   :  { %v118_v29 = vstv %s115_s12  ;;  %s123_s18 = scvt.s32.f32 %s1421_s24  ;;  %v125_v30 = vld [vmem:[%s124_s30] sm:$0x1]  ;;  %s1447_s20 = sld [smem:[#allocation6 + $0x8a]]  ;;  %564 = vmatpush.msrb.mxu0 %v1173_v24 }
  0x1f   :  { %112 = vst.msk [vmem:[#allocation2 + $0x5] sm:$0x1] %vm71_vm1, %v111_v28  ;;  %v119_v31 = vmul.f32 %v118_v29, %v117_v27  ;;  %s132_s23 = scalar_lea.vmem %s1938_s3, %s1427_s29  ;;  %s1454_s1 = sld [smem:[#allocation3 + $0x8b]] }
  0x20   :  { %v126_v34 = vstv %s123_s18  ;;  %s131_s24 = scvt.s32.f32 %s1429_s25  ;;  %v133_v35 = vld [vmem:[%s132_s23] sm:$0x1]  ;;  %s1463_s28 = sld [smem:[#allocation6 + $0x8b]] }
  0x21   :  { %120 = vst.msk [vmem:[#allocation2 + $0x6] sm:$0x1] %vm71_vm1, %v119_v31  ;;  %v127_v37 = vmul.f32 %v126_v34, %v125_v30  ;;  %s268_s14 = scalar_lea.vmem %s1938_s3, %s1435_s15  ;;  %s1473_s27 = sld [smem:[#allocation3 + $0x8c]] }
  0x22   :  { %v134_v40 = vstv %s131_s24  ;;  %s267_s0 = scvt.s32.f32 %s1438_s17  ;;  %v269_v41 = vld [vmem:[%s268_s14] sm:$0x1]  ;;  %s1482_s23 = sld [smem:[#allocation6 + $0x8c]] }
  0x23   :  { %128 = vst.msk [vmem:[#allocation2 + $0x7] sm:$0x1] %vm71_vm1, %v127_v37  ;;  %v135_v42 = vmul.f32 %v134_v40, %v133_v35  ;;  %s276_s26 = scalar_lea.vmem %s1938_s3, %s1444_s16  ;;  %s1489_s22 = sld [smem:[#allocation3 + $0x8d]] }
  0x24   :  { %v270_v44 = vstv %s267_s0  ;;  %s275_s17 = scvt.s32.f32 %s1447_s20  ;;  %v277_v45 = vld [vmem:[%s276_s26] sm:$0x1]  ;;  %s1495_s24 = sld [smem:[#allocation6 + $0x8d]] }
  0x25   :  { %136 = vst.msk [vmem:[#allocation2 + $0x8] sm:$0x1] %vm71_vm1, %v135_v42  ;;  %v271_v46 = vmul.f32 %v270_v44, %v269_v41  ;;  %s284_s16 = scalar_lea.vmem %s1938_s3, %s1454_s1  ;;  %s1502_s12 = sld [smem:[#allocation3 + $0x8e]] }
  0x26   :  { %v278_v47 = vstv %s275_s17  ;;  %s283_s14 = scvt.s32.f32 %s1463_s28  ;;  %v285_v48 = vld [vmem:[%s284_s16] sm:$0x1]  ;;  %s1505_s20 = sld [smem:[#allocation6 + $0x8e]] }
  0x27   :  { %272 = vst.msk [vmem:[#allocation2 + $0x19] sm:$0x1] %vm71_vm1, %v271_v46  ;;  %v279_v49 = vmul.f32 %v278_v47, %v277_v45  ;;  %s292_s18 = scalar_lea.vmem %s1938_s3, %s1473_s27  ;;  %s1512_s19 = sld [smem:[#allocation3 + $0x8f]] }
  0x28   :  { %v286_v50 = vstv %s283_s14  ;;  %s291_s1 = scvt.s32.f32 %s1482_s23  ;;  %v293_v51 = vld [vmem:[%s292_s18] sm:$0x1]  ;;  %s1515_s28 = sld [smem:[#allocation6 + $0x8f]] }
  0x29   :  { %280 = vst.msk [vmem:[#allocation2 + $0x1a] sm:$0x1] %vm71_vm1, %v279_v49  ;;  %v287_v52 = vmul.f32 %v286_v50, %v285_v48  ;;  %s300_s21 = scalar_lea.vmem %s1938_s3, %s1489_s22  ;;  %s1522_s26 = sld [smem:[#allocation3]] }
  0x2a   :  { %v294_v53 = vstv %s291_s1  ;;  %s299_s27 = scvt.s32.f32 %s1495_s24  ;;  %v301_v54 = vld [vmem:[%s300_s21] sm:$0x1]  ;;  %s1525_s10 = sld [smem:[#allocation6]] }
  0x2b   :  { %288 = vst.msk [vmem:[#allocation2 + $0x1b] sm:$0x1] %vm71_vm1, %v287_v52  ;;  %v295_v55 = vmul.f32 %v294_v53, %v293_v51  ;;  %s308_s17 = scalar_lea.vmem %s1938_s3, %s1502_s12  ;;  %s1532_s29 = sld [smem:[#allocation3 + $0x9]] }
  0x2c   :  { %v329_v56 = vld [vmem:[#allocation2 + $0x1] sm:$0xff]  ;;  %v302_v57 = vstv %s299_s27  ;;  %s307_s22 = scvt.s32.f32 %s1505_s20  ;;  %v309_v58 = vld [vmem:[%s308_s17] sm:$0x1]  ;;  %s1535_s13 = sld [smem:[#allocation6 + $0x9]] }
  0x2d   :  { %1149 = vmatmul.msk.f32.vlgmr.msra.gmra.mxu0 %vm58_vm0, %v329_v56  ;;  %296 = vst.msk [vmem:[#allocation2 + $0x1c] sm:$0x1] %vm71_vm1, %v295_v55  ;;  %v303_v59 = vmul.f32 %v302_v57, %v301_v54  ;;  %s316_s14 = scalar_lea.vmem %s1938_s3, %s1512_s19  ;;  %s1543_s12 = sld [smem:[#allocation3 + $0xa]] }
  0x2e   :  { %v310_v60 = vstv %s307_s22  ;;  %s315_s25 = scvt.s32.f32 %s1515_s28  ;;  %v317_v61 = vld [vmem:[%s316_s14] sm:$0x1]  ;;  %s1546_s20 = sld [smem:[#allocation6 + $0xa]] }
  0x2f   :  { %304 = vst.msk [vmem:[#allocation2 + $0x1d] sm:$0x1] %vm71_vm1, %v303_v59  ;;  %v311_v62 = vmul.f32 %v310_v60, %v309_v58  ;;  %s67_s1 = scalar_lea.vmem %s1938_s3, %s1522_s26  ;;  %s1553_s0 = sld [smem:[#allocation3 + $0xb]] }
  0x30   :  { %v318_v0 = vstv %s315_s25  ;;  %s66_s28 = scvt.s32.f32 %s1525_s10  ;;  %v68_v1 = vld [vmem:[%s67_s1] sm:$0x1]  ;;  %s1559_s21 = sld [smem:[#allocation6 + $0xb]] }
  0x31   :  { %312 = vst.msk [vmem:[#allocation2 + $0x1e] sm:$0x1] %vm71_vm1, %v311_v62  ;;  %v319_v2 = vmul.f32 %v318_v0, %v317_v61  ;;  %s140_s26 = scalar_lea.vmem %s1938_s3, %s1532_s29  ;;  %s1105_s11 = sld [smem:[#allocation3 + $0xc]] }
  0x32   :  { %v69_v3 = vstv %s66_s28  ;;  %s139_s17 = scvt.s32.f32 %s1535_s13  ;;  %v141_v4 = vld [vmem:[%s140_s26] sm:$0x1]  ;;  %s1567_s22 = sld [smem:[#allocation6 + $0xc]] }
  0x33   :  { %320 = vst.msk [vmem:[#allocation2 + $0x1f] sm:$0x1] %vm71_vm1, %v319_v2  ;;  %v70_v5 = vmul.f32 %v69_v3, %v68_v1  ;;  %s148_s16 = scalar_lea.vmem %s1938_s3, %s1543_s12  ;;  %s1107_s14 = sld [smem:[#allocation3 + $0xd]] }
  0x34   :  { %v142_v7 = vstv %s139_s17  ;;  %s147_s25 = scvt.s32.f32 %s1546_s20  ;;  %v149_v8 = vld [vmem:[%s148_s16] sm:$0x1]  ;;  %s1575_s29 = sld [smem:[#allocation6 + $0xd]] }
  0x35   :  { %72 = vst.msk [vmem:[#allocation2] sm:$0x1] %vm71_vm1, %v70_v5  ;;  %v143_v9 = vmul.f32 %v142_v7, %v141_v4  ;;  %s156_s18 = scalar_lea.vmem %s1938_s3, %s1553_s0  ;;  %s1582_s1 = sld [smem:[#allocation3 + $0xe]] }
  0x36   :  { %v150_v10 = vstv %s147_s25  ;;  %s155_s15 = scvt.s32.f32 %s1559_s21  ;;  %v157_v11 = vld [vmem:[%s156_s18] sm:$0x1]  ;;  %s1585_s12 = sld [smem:[#allocation6 + $0xe]] }
  0x37   :  { %144 = vst.msk [vmem:[#allocation2 + $0x9] sm:$0x1] %vm71_vm1, %v143_v9  ;;  %v151_v12 = vmul.f32 %v150_v10, %v149_v8  ;;  %s164_s28 = scalar_lea.vmem %s1938_s3, %s1105_s11  ;;  %s1591_s27 = sld [smem:[#allocation3 + $0xf]] }
  0x38   :  { %v158_v13 = vstv %s155_s15  ;;  %s163_s0 = scvt.s32.f32 %s1567_s22  ;;  %v165_v14 = vld [vmem:[%s164_s28] sm:$0x1]  ;;  %s1594_s23 = sld [smem:[#allocation6 + $0xf]] }
  0x39   :  { %152 = vst.msk [vmem:[#allocation2 + $0xa] sm:$0x1] %vm71_vm1, %v151_v12  ;;  %v159_v15 = vmul.f32 %v158_v13, %v157_v11  ;;  %s172_s17 = scalar_lea.vmem %s1938_s3, %s1107_s14  ;;  %s1600_s10 = sld [smem:[#allocation3 + $0x80]] }
  0x3a   :  { %v332_v16 = vld [vmem:[#allocation2 + $0x19] sm:$0xff]  ;;  %v166_v17 = vstv %s163_s0  ;;  %s171_s11 = scvt.s32.f32 %s1575_s29  ;;  %s1603_s24 = sld [smem:[#allocation6 + $0x80]] }
  0x3b   :  { %v173_v18 = vld [vmem:[%s172_s17] sm:$0x1]  ;;  %1152 = vmatmul.msk.f32.vlgmr.msra.gmra.mxu3 %vm58_vm0, %v332_v16  ;;  %160 = vst.msk [vmem:[#allocation2 + $0xb] sm:$0x1] %vm71_vm1, %v159_v15  ;;  %v167_v19 = vmul.f32 %v166_v17, %v165_v14  ;;  %s180_s25 = scalar_lea.vmem %s1938_s3, %s1582_s1  ;;  %s1611_s14 = sld [smem:[#allocation3 + $0x81]] }
  0x3c   :  { %v321_v20 = vld [vmem:[#allocation2] sm:$0xff]  ;;  %v174_v21 = vstv %s171_s11  ;;  %s179_s13 = scvt.s32.f32 %s1585_s12  ;;  %s1614_s29 = sld [smem:[#allocation6 + $0x81]] }
  0x3d   :  { %v181_v22 = vld [vmem:[%s180_s25] sm:$0x1]  ;;  %1153 = vmatmul.msk.f32.vlgmr.msra.gmra.mxu1 %vm58_vm0, %v321_v20  ;;  %168 = vst.msk [vmem:[#allocation2 + $0xc] sm:$0x1] %vm71_vm1, %v167_v19  ;;  %v175_v23 = vmul.f32 %v174_v21, %v173_v18  ;;  %s188_s15 = scalar_lea.vmem %s1938_s3, %s1591_s27  ;;  %s1622_s1 = sld [smem:[#allocation3 + $0x82]]  ;;  %v627_v18 = vld [vmem:[%s1941_s6 + $0x50] sm:$0xff] }
  0x3e   :  { %v420_v25 = vld [vmem:[#allocation2 + $0x2] sm:$0xff]  ;;  %v182_v26 = vstv %s179_s13  ;;  %s187_s12 = scvt.s32.f32 %s1594_s23  ;;  %v189_v27 = vld [vmem:[%s188_s15] sm:$0x1]  ;;  %s1628_s28 = sld [smem:[#allocation6 + $0x82]]  ;;  %664 = vmatpush.msrb.mxu1 %v627_v18 }
  0x3f   :  { %1161 = vmatmul.msk.f32.vlgmr.msra.gmra.mxu2 %vm58_vm0, %v420_v25  ;;  %176 = vst.msk [vmem:[#allocation2 + $0xd] sm:$0x1] %vm71_vm1, %v175_v23  ;;  %v183_v28 = vmul.f32 %v182_v26, %v181_v22  ;;  %s196_s21 = scalar_lea.vmem %s1938_s3, %s1600_s10  ;;  %s1636_s26 = sld [smem:[#allocation3 + $0x83]]  ;;  %v423_v4 = vld [vmem:[#allocation2 + $0x1a] sm:$0xff] }
  0x40   :  { %v190_v29 = vstv %s187_s12  ;;  %s195_s4 = scvt.s32.f32 %s1603_s24  ;;  %v197_v30 = vld [vmem:[%s196_s21] sm:$0x1]  ;;  %v474_v31 = vld [vmem:[#allocation2 + $0x3] sm:$0xff]  ;;  %s1639_s23 = sld [smem:[#allocation6 + $0x83]] }
  0x41   :  { %184 = vst.msk [vmem:[#allocation2 + $0xe] sm:$0x1] %vm71_vm1, %v183_v28  ;;  %v191_v32 = vmul.f32 %v190_v29, %v189_v27  ;;  %s204_s22 = scalar_lea.vmem %s1938_s3, %s1611_s14  ;;  %s1121_s16 = sld [smem:[#allocation3 + $0x84]]  ;;  %v477_v7 = vld [vmem:[#allocation2 + $0x1b] sm:$0xff] }
  0x42   :  { %v198_v33 = vstv %s195_s4  ;;  %s203_s10 = scvt.s32.f32 %s1614_s29  ;;  %v205_v34 = vld [vmem:[%s204_s22] sm:$0x1]  ;;  %s1647_s25 = sld [smem:[#allocation6 + $0x84]]  ;;  %v528_v5 = vld [vmem:[#allocation2 + $0x4] sm:$0xff]  ;;  %v628_v28 = vld [vmem:[%s1941_s6 + $0x58] sm:$0xff] }
  0x43   :  { %192 = vst.msk [vmem:[#allocation2 + $0xf] sm:$0x1] %vm71_vm1, %v191_v32  ;;  %v199_v35 = vmul.f32 %v198_v33, %v197_v30  ;;  %1169 = vmatmul.msk.f32.vlgmr.msrb.gmra.mxu3 %vm58_vm0, %v474_v31  ;;  %s212_s30 = scalar_lea.vmem %s1938_s3, %s1622_s1  ;;  %s1123_s18 = sld [smem:[#allocation3 + $0x85]]  ;;  %v531_v10 = vld [vmem:[#allocation2 + $0x1c] sm:$0xff]  ;;  %684 = vmatpush.msrb.mxu2 %v628_v28  ;;  %v626_v32 = vld [vmem:[%s1941_s6 + $0x48] sm:$0xff] }
  0x44   :  { %v206_v36 = vstv %s203_s10  ;;  %s211_s14 = scvt.s32.f32 %s1628_s28  ;;  %v213_v37 = vld [vmem:[%s212_s30] sm:$0x1]  ;;  %s1656_s15 = sld [smem:[#allocation6 + $0x85]] }
  0x45   :  { %200 = vst.msk [vmem:[#allocation2 + $0x10] sm:$0x1] %vm71_vm1, %v199_v35  ;;  %v207_v38 = vmul.f32 %v206_v36, %v205_v34  ;;  %s220_s19 = scalar_lea.vmem %s1938_s3, %s1636_s26  ;;  %s1663_s12 = sld [smem:[#allocation3 + $0x86]]  ;;  %v625_v19 = vld [vmem:[%s1941_s6 + $0x40] sm:$0xff]  ;;  %v583_v35 = vld [vmem:[%s1940_s5 + $0x8] sm:$0xff]  ;;  %685 = vmatpush.msrb.mxu2 %v626_v32 }
  0x46   :  { %v214_v39 = vstv %s211_s14  ;;  %s219_s27 = scvt.s32.f32 %s1639_s23  ;;  %v221_v40 = vld [vmem:[%s220_s19] sm:$0x1]  ;;  %s1666_s1 = sld [smem:[#allocation6 + $0x86]]  ;;  %665 = vmatpush.msrb.mxu1 %v625_v19 }
  0x47   :  { %208 = vst.msk [vmem:[#allocation2 + $0x11] sm:$0x1] %vm71_vm1, %v207_v38  ;;  %v215_v41 = vmul.f32 %v214_v39, %v213_v37  ;;  %s228_s21 = scalar_lea.vmem %s1938_s3, %s1121_s16  ;;  %s1672_s4 = sld [smem:[#allocation3 + $0x87]]  ;;  %v623_v38 = vld [vmem:[%s1941_s6 + $0x30] sm:$0xff]  ;;  %v624_v39 = vld [vmem:[%s1941_s6 + $0x38] sm:$0xff] }
  0x48   :  { %v222_v42 = vstv %s219_s27  ;;  %s227_s26 = scvt.s32.f32 %s1647_s25  ;;  %v229_v43 = vld [vmem:[%s228_s21] sm:$0x1]  ;;  %s1675_s17 = sld [smem:[#allocation6 + $0x87]]  ;;  %666 = vmatpush.msrb.mxu1 %v623_v38  ;;  %686 = vmatpush.msrb.mxu2 %v624_v39 }
  0x49   :  { %216 = vst.msk [vmem:[#allocation2 + $0x12] sm:$0x1] %vm71_vm1, %v215_v41  ;;  %v223_v44 = vmul.f32 %v222_v42, %v221_v40  ;;  %s236_s22 = scalar_lea.vmem %s1938_s3, %s1123_s18  ;;  %s1129_s10 = sld [smem:[#allocation3 + $0x88]]  ;;  %v582_v40 = vld [vmem:[%s1940_s5] sm:$0xff] }
  0x4a   :  { %v322_v45 = vld [vmem:[#allocation2 + $0x8] sm:$0xff]  ;;  %v230_v46 = vstv %s227_s26  ;;  %s235_s16 = scvt.s32.f32 %s1656_s15  ;;  %v237_v47 = vld [vmem:[%s236_s22] sm:$0x1]  ;;  %s1130_s24 = sld [smem:[#allocation6 + $0x88]] }
  0x4b   :  { %1154 = vmatmul.msk.f32.gmra.mxu1 %vm58_vm0, %v322_v45  ;;  %224 = vst.msk [vmem:[#allocation2 + $0x13] sm:$0x1] %vm71_vm1, %v223_v44  ;;  %v231_v48 = vmul.f32 %v230_v46, %v229_v43  ;;  %s244_s30 = scalar_lea.vmem %s1938_s3, %s1663_s12  ;;  %v621_v42 = vld [vmem:[%s1941_s6 + $0x20] sm:$0xff]  ;;  %v619_v44 = vld [vmem:[%s1941_s6 + $0x10] sm:$0xff]  ;;  %v622_v45 = vld [vmem:[%s1941_s6 + $0x28] sm:$0xff]  ;;  %s1040_s21 = sshll.u32 %s1944_s9, 4  ;;  %s1041_s21 = int_to_ptr.hbm [resolvable:$true] %s1040_s21 }
  0x4c   :  { %v330_v49 = vld [vmem:[#allocation2 + $0x9] sm:$0xff]  ;;  %v238_v50 = vstv %s235_s16  ;;  %s243_s18 = scvt.s32.f32 %s1666_s1  ;;  %v245_v51 = vld [vmem:[%s244_s30] sm:$0x1]  ;;  %v620_v46 = vld [vmem:[%s1941_s6 + $0x18] sm:$0xff]  ;;  %667 = vmatpush.msrb.mxu1 %v621_v42  ;;  %687 = vmatpush.msrb.mxu2 %v622_v45 }
  0x4d   :  { %1150 = vmatmul.msk.f32.gmra.mxu0 %vm58_vm0, %v330_v49  ;;  %232 = vst.msk [vmem:[#allocation2 + $0x14] sm:$0x1] %vm71_vm1, %v231_v48  ;;  %v239_v52 = vmul.f32 %v238_v50, %v237_v47  ;;  %s252_s29 = scalar_lea.vmem %s1938_s3, %s1672_s4  ;;  %v617_v48 = vld [vmem:[%s1941_s6] sm:$0xff]  ;;  %v618_v49 = vld [vmem:[%s1941_s6 + $0x8] sm:$0xff] }
  0x4e   :  { %v421_v53 = vld [vmem:[#allocation2 + $0xa] sm:$0xff]  ;;  %v246_v54 = vstv %s243_s18  ;;  %s251_s20 = scvt.s32.f32 %s1675_s17  ;;  %v253_v55 = vld [vmem:[%s252_s29] sm:$0x1]  ;;  %668 = vmatpush.msrb.mxu1 %v619_v44  ;;  %688 = vmatpush.msrb.mxu2 %v620_v46 }
  0x4f   :  { %1162 = vmatmul.msk.f32.gmra.mxu2 %vm58_vm0, %v421_v53  ;;  %240 = vst.msk [vmem:[#allocation2 + $0x15] sm:$0x1] %vm71_vm1, %v239_v52  ;;  %v247_v56 = vmul.f32 %v246_v54, %v245_v51  ;;  %s260_s27 = scalar_lea.vmem %s1938_s3, %s1129_s10  ;;  %s1289_s10 = smov 64  }
  0x50   :  { %v254_v57 = vstv %s251_s20  ;;  %s259_s1 = scvt.s32.f32 %s1130_s24  ;;  %v261_v58 = vld [vmem:[%s260_s27] sm:$0x1]  ;;  %v475_v59 = vld [vmem:[#allocation2 + $0xb] sm:$0xff]  ;;  %669 = vmatpush.msrb.mxu1 %v617_v48  ;;  %689 = vmatpush.msrb.mxu2 %v618_v49  ;;  %s1291_s3 = smov [#allocation8]  }
  0x51   :  { %248 = vst.msk [vmem:[#allocation2 + $0x16] sm:$0x1] %vm71_vm1, %v247_v56  ;;  %v255_v60 = vmul.f32 %v254_v57, %v253_v55  ;;  %1170 = vmatmul.msk.f32.gmra.mxu3 %vm58_vm0, %v475_v59  ;;  %v643_v49 = vld [vmem:[%s1941_s6 + $0xd0] sm:$0xff] }
  0x52   :  { %v262_v61 = vstv %s259_s1  ;;  %v529_v8 = vld [vmem:[#allocation2 + $0xc] sm:$0xff]  ;;  %741 = vmatpush.msra.mxu3 %v643_v49 }
  0x53   :  { %256 = vst.msk [vmem:[#allocation2 + $0x17] sm:$0x1] %vm71_vm1, %v255_v60  ;;  %v263_v62 = vmul.f32 %v262_v61, %v261_v58  ;;  %v917_v49 = vld [vmem:[%s1942_s7 + $0x88] sm:$0xff] }
  0x55   :  { %264 = vst.msk [vmem:[#allocation2 + $0x18] sm:$0x1] %vm71_vm1, %v263_v62  ;;  %vm878_vm1 = vcmask 56320  }
  0x5a   :  { %v323_v63 = vld [vmem:[#allocation2 + $0x10] sm:$0xff] }
  0x5b   :  { %1155 = vmatmul.msk.f32.gmra.mxu1 %vm58_vm0, %v323_v63 }
  0x5c   :  { %v331_v0 = vld [vmem:[#allocation2 + $0x11] sm:$0xff] }
  0x5d   :  { %v422_v1 = vld [vmem:[#allocation2 + $0x12] sm:$0xff]  ;;  %1151 = vmatmul.msk.f32.gmra.mxu0 %vm58_vm0, %v331_v0 }
  0x5e   :  { %1163 = vmatmul.msk.f32.gmra.mxu2 %vm58_vm0, %v422_v1  ;;  %v476_v2 = vld [vmem:[#allocation2 + $0x13] sm:$0xff] }
  0x5f   :  { %1171 = vmatmul.msk.f32.gmra.mxu3 %vm58_vm0, %v476_v2  ;;  %v324_v3 = vld [vmem:[#allocation2 + $0x18] sm:$0xff]  ;;  %v584_v0 = vld [vmem:[%s1940_s5 + $0x10] sm:$0xff] }
  0x60   :  { %v530_v9 = vld [vmem:[#allocation2 + $0x14] sm:$0xff] }
  0x63   :  { %1156 = vmatmul.msk.f32.gmra.mxu1 %vm58_vm0, %v324_v3  ;;  %v585_v3 = vld [vmem:[%s1940_s5 + $0x18] sm:$0xff] }
  0x65   :  { %1177 = vmatmul.msk.f32.vlgmr.msrb.gmra.mxu0 %vm58_vm0, %v528_v5 }
  0x66   :  { %1164 = vmatmul.msk.f32.gmra.mxu2 %vm58_vm0, %v423_v4 }
  0x67   :  { %1172 = vmatmul.msk.f32.gmra.mxu3 %vm58_vm0, %v477_v7 }
  0x6d   :  { %1178 = vmatmul.msk.f32.gmra.mxu0 %vm58_vm0, %v529_v8 }
  0x75   :  { %1179 = vmatmul.msk.f32.gmra.mxu0 %vm58_vm0, %v530_v9 }
  0x7d   :  { %1180 = vmatmul.msk.f32.gmra.mxu0 %vm58_vm0, %v531_v10 }
  0xaa   :  { %v367_v11 = vpop.f32.mrf.mxu0 }
  0xba   :  { %v408_v14 = vpop.f32.mrf.mxu1 }
  0xbb   :  { %v409_v24 = vadd.f32 %v408_v14, %v367_v11 }
  0xbe   :  { %v376_v12 = vpop.f32.mrf.mxu3 }
  0xc2   :  { %v458_v15 = vpop.f32.mrf.mxu2 }
  0xc3   :  { %v470_v26 = vadd.f32 %v458_v15, %v409_v24 }
  0xc6   :  { %v512_v16 = vpop.f32.mrf.mxu3 }
  0xc7   :  { %v524_v30 = vadd.f32 %v512_v16, %v470_v26  ;;  %v645_v26 = vld [vmem:[%s1943_s8 + $0x1] sm:$0x3] }
  0xc8   :  { %v411_v20 = vpop.f32.mrf.mxu1 }
  0xca   :  { %v370_v13 = vpop.f32.mrf.mxu0 }
  0xcb   :  { %v412_v25 = vadd.f32 %v411_v20, %v370_v13  ;;  %v1211_v20 = vld [vmem:[%s1943_s8] ss:$0 sm:$0xff] }
  0xd2   :  { %v461_v21 = vpop.f32.mrf.mxu2 }
  0xd3   :  { %v471_v27 = vadd.f32 %v461_v21, %v412_v25 }
  0xd4   :  { %v515_v22 = vpop.f32.mrf.mxu3 }
  0xd5   :  { %v525_v31 = vadd.f32 %v515_v22, %v471_v27  ;;  %v647_v27 = vperm.slane %v645_v26, 0 }
  0xd8   :  { %v414_v29 = vpop.f32.mrf.mxu1 }
  0xda   :  { %v373_v17 = vpop.f32.mrf.mxu0 }
  0xdb   :  { %v415_v50 = vadd.f32 %v414_v29, %v373_v17 }
  0xe0   :  { %v417_v52 = vpop.f32.mrf.mxu1 }
  0xe1   :  { %v464_v33 = vpop.f32.mrf.mxu2  ;;  %v418_v58 = vadd.f32 %v417_v52, %v376_v12  ;;  %v639_v52 = vld [vmem:[%s1941_s6 + $0xb0] sm:$0xff] }
  0xe2   :  { %v566_v23 = vpop.f32.mrf.mxu0  ;;  %v518_v41 = vpop.f32.mrf.mxu3  ;;  %v472_v54 = vadd.f32 %v464_v33, %v415_v50  ;;  %v648_v33 = vperm.slane %v645_v26, 1  ;;  %v641_v50 = vld [vmem:[%s1941_s6 + $0xc0] sm:$0xff]  ;;  %v802_v26 = vld [vmem:[%s1942_s7 + $0x8] sm:$0xff] }
  0xe3   :  { %v578_v36 = vadd.f32 %v566_v23, %v524_v30  ;;  %742 = vmatpush.msra.mxu3 %v641_v50  ;;  %v911_v50 = vld [vmem:[%s1942_s7 + $0x58] sm:$0xff] }
  0xe4   :  { %v526_v59 = vadd.f32 %v518_v41, %v472_v54  ;;  %v640_v54 = vld [vmem:[%s1941_s6 + $0xb8] sm:$0xff] }
  0xe5   :  { %v586_v47 = vadd.f32 %v582_v40, %v578_v36  ;;  %743 = vmatpush.msra.mxu3 %v639_v52  ;;  %v910_v52 = vld [vmem:[%s1942_s7 + $0x50] sm:$0xff] }
  0xe7   :  { %v591_v55 = vsel %vm590_vm2, %v586_v47, -inf }
  0xe9   :  { %v467_v56 = vpop.f32.mrf.mxu2 }
  0xea   :  { %v569_v34 = vpop.f32.mrf.mxu0  ;;  %v521_v60 = vpop.f32.mrf.mxu3  ;;  %v473_v61 = vadd.f32 %v467_v56, %v418_v58  ;;  %v638_v56 = vld [vmem:[%s1941_s6 + $0xa8] sm:$0xff]  ;;  %v636_v58 = vld [vmem:[%s1941_s6 + $0x98] sm:$0xff] }
  0xeb   :  { %v579_v37 = vadd.f32 %v569_v34, %v525_v31 }
  0xec   :  { %v527_v1 = vadd.f32 %v521_v60, %v473_v61  ;;  %v634_v60 = vld [vmem:[%s1941_s6 + $0x88] sm:$0xff]  ;;  %v631_v61 = vld [vmem:[%s1941_s6 + $0x70] sm:$0xff] }
  0xed   :  { %v587_v43 = vadd.f32 %v583_v35, %v579_v37 }
  0xef   :  { %v592_v51 = vsel %vm590_vm2, %v587_v43, -inf }
  0xf0   :  { %v593_v57 = vmax.f32 %v591_v55, %v592_v51  ;;  %v644_v51 = vld [vmem:[%s1941_s6 + $0xd8] sm:$0xff]  ;;  %v637_v55 = vld [vmem:[%s1941_s6 + $0xa0] sm:$0xff] }
  0xf1   :  { %761 = vmatpush.msra.mxu1 %v644_v51  ;;  %744 = vmatpush.msra.mxu3 %v637_v55  ;;  %v915_v51 = vld [vmem:[%s1942_s7 + $0x78] sm:$0xff]  ;;  %v914_v55 = vld [vmem:[%s1942_s7 + $0x70] sm:$0xff] }
  0xf2   :  { %v572_v53 = vpop.f32.mrf.mxu0  ;;  %v594_v63 = vrot.slane %v593_v57, 4 }
  0xf3   :  { %v580_v62 = vadd.f32 %v572_v53, %v526_v59  ;;  %v642_v53 = vld [vmem:[%s1941_s6 + $0xc8] sm:$0xff]  ;;  %v633_v59 = vld [vmem:[%s1941_s6 + $0x80] sm:$0xff] }
  0xf4   :  { %v595_v7 = vmax.f32 %v593_v57, %v594_v63  ;;  %762 = vmatpush.msra.mxu1 %v642_v53  ;;  %v635_v57 = vld [vmem:[%s1941_s6 + $0x90] sm:$0xff]  ;;  %v629_v63 = vld [vmem:[%s1941_s6 + $0x60] sm:$0xff]  ;;  %v921_v53 = vld [vmem:[%s1942_s7 + $0xa8] sm:$0xff] }
  0xf5   :  { %v588_v4 = vadd.f32 %v584_v0, %v580_v62  ;;  %745 = vmatpush.msra.mxu3 %v635_v57  ;;  %v632_v62 = vld [vmem:[%s1941_s6 + $0x78] sm:$0xff]  ;;  %v630_v0 = vld [vmem:[%s1941_s6 + $0x68] sm:$0xff] }
  0xf6   :  { %v596_v11 = vrot.slane %v595_v7, 2  ;;  %763 = vmatpush.msra.mxu1 %v640_v54  ;;  %v920_v54 = vld [vmem:[%s1942_s7 + $0xa0] sm:$0xff]  ;;  %v919_v57 = vld [vmem:[%s1942_s7 + $0x98] sm:$0xff] }
  0xf7   :  { %v600_v9 = vsel %vm590_vm2, %v588_v4, -inf  ;;  %746 = vmatpush.msra.mxu3 %v633_v59  ;;  %v800_v4 = vld [vmem:[%s1937_s2] sm:$0x3]  ;;  %v907_v59 = vld [vmem:[%s1942_s7 + $0x38] sm:$0xff] }
  0xf8   :  { %v597_v14 = vmax.f32 %v595_v7, %v596_v11  ;;  %764 = vmatpush.msra.mxu1 %v638_v56  ;;  %v866_v7 = vadd.f32 0.5, %v800_v4  ;;  %v721_v11 = vld [vmem:[%s1943_s8 + $0x3] sm:$0x3]  ;;  %v909_v56 = vld [vmem:[%s1942_s7 + $0x48] sm:$0xff] }
  0xf9   :  { %747 = vmatpush.msra.mxu3 %v631_v61  ;;  %v1213_v61 = vld [vmem:[%s1943_s8 + $0x6] ss:$0 sm:$0xff] }
  0xfa   :  { %v575_v2 = vpop.f32.mrf.mxu0  ;;  %v598_v17 = vrot.slane %v597_v14, 1  ;;  %765 = vmatpush.msra.mxu1 %v636_v58  ;;  %v908_v58 = vld [vmem:[%s1942_s7 + $0x40] sm:$0xff] }
  0xfb   :  { %v581_v5 = vadd.f32 %v575_v2, %v527_v1  ;;  %748 = vmatpush.msra.mxu3 %v629_v63 }
  0xfc   :  { %v599_v21 = vmax.f32 %v597_v14, %v598_v17  ;;  %766 = vmatpush.msra.mxu1 %v634_v60  ;;  %v804_v17 = vld [vmem:[%s1942_s7 + $0x18] sm:$0xff]  ;;  %v906_v60 = vld [vmem:[%s1942_s7 + $0x30] sm:$0xff] }
  0xfd   :  { %v589_v8 = vadd.f32 %v585_v3, %v581_v5  ;;  %v801_v3 = vld [vmem:[%s1942_s7] sm:$0x3f] }
  0xfe   :  { %767 = vmatpush.msra.mxu1 %v632_v62  ;;  %1187 = vmatpush.msk.msra.mxu2 %vm814_vm8, %v801_v3 }
  0xff   :  { %v601_v10 = vsel %vm590_vm2, %v589_v8, -inf  ;;  %v867_v8 = vfloor.f32 %v866_v7  ;;  %v1002_v7 = vld [vmem:[%s1942_s7 + $0xc0] sm:$0xff] }
 0x100   :  { %v602_v12 = vmax.f32 %v600_v9, %v601_v10  ;;  %768 = vmatpush.msra.mxu1 %v630_v0  ;;  %v1290_v9 = vmov 6  }
 0x101   :  { %1209 = vset.pattern.permute.xlu1 %v1290_v9  ;;  %1210 = vset.pattern.permute.xlu0 %v1290_v9  ;;  %v1202_v10 = vcvt.f32.s32 %v867_v8  ;;  %v1001_v8 = vld [vmem:[%s1942_s7 + $0xb8] sm:$0xff]  ;;  %v1000_v9 = vld [vmem:[%s1942_s7 + $0xb0] sm:$0xff] }
 0x102   :  { %v603_v13 = vrot.slane %v602_v12, 4 }
 0x103   :  { %872 = vperm.xlu1 %1209, %v1202_v10  }
 0x104   :  { %v604_v15 = vmax.f32 %v602_v12, %v603_v13  ;;  %v723_v12 = vperm.slane %v721_v11, 0 }
 0x106   :  { %v605_v16 = vrot.slane %v604_v15, 2 }
 0x108   :  { %v606_v18 = vmax.f32 %v604_v15, %v605_v16  ;;  %v805_v16 = vld [vmem:[%s1942_s7 + $0x20] sm:$0xff] }
 0x109   :  { %858 = vmatpush.msrb.mxu3 %v805_v16 }
 0x10a   :  { %v607_v19 = vrot.slane %v606_v18, 1 }
 0x10b   :  { %859 = vmatpush.msrb.mxu3 %v804_v17 }
 0x10c   :  { %v608_v22 = vmax.f32 %v606_v18, %v607_v19  ;;  %v1212_v18 = vld [vmem:[%s1943_s8 + $0x5] ss:$0 sm:$0xff] }
 0x10e   :  { %v610_v23 = vsel %vm609_vm3, %v599_v21, %v608_v22  ;;  %v803_v22 = vld [vmem:[%s1942_s7 + $0x10] sm:$0xff]  ;;  %vm1031_vm3 = vcmask 254976  }
 0x10f   :  { %v615_v24 = vadd.f32 %v1211_v20, %v610_v23  ;;  %v877_v20 = vld [vmem:[%s1942_s7 + $0x28] sm:$0x7f]  ;;  %860 = vmatpush.msrb.mxu3 %v803_v22 }
 0x111   :  { %v616_v25 = vmax.f32 %v615_v24, 0.0  ;;  %861 = vmatpush.msrb.mxu3 %v802_v26 }
 0x113   :  { %1181 = vmatmul.msk.f32.vlgmr.msrb.gmra.mxu1 %vm590_vm2, %v616_v25  ;;  %1182 = vmatmul.msk.f32.vlgmr.msrb.gmra.mxu2 %vm590_vm2, %v616_v25 }
 0x114   :  { %1191 = vmatpush.msk.msrb.mxu2 %vm882_vm11, %v877_v20  ;;  %985 = vmatpush.msrb.mxu1 %v921_v53 }
 0x116   :  { %986 = vmatpush.msrb.mxu1 %v920_v54 }
 0x118   :  { %987 = vmatpush.msrb.mxu1 %v919_v57 }
 0x11b   :  { %1188 = vmatmul.msk.f32.vlgmr.msra.gmra.mxu2 %vm810_vm9, %v800_v4 }
 0x190   :  { %v671_v28 = vpop.f32.mrf.mxu1 }
 0x191   :  { %v672_v29 = vadd.f32 %v671_v28, %v647_v27  ;;  %v724_v27 = vperm.slane %v721_v11, 1 }
 0x193   :  { %v1183_v30 = vmul.f32 -1.442695, %v672_v29 }
 0x195   :  { %1216 = vpow2.f32 %v1183_v30 }
 0x196   :  { %v691_v34 = vpop.f32.mrf.mxu2 }
 0x197   :  { %v692_v36 = vadd.f32 %v691_v34, %v648_v33 }
 0x19b   :  { %v1217_v31 = vpop.eup %1216 }
 0x19c   :  { %v697_v32 = vadd.f32 1.0, %v1217_v31 }
 0x19e   :  { %1218 = vrcp.f32 %v697_v32  ;;  %v709_v39 = vand.u32 2147483648, %v697_v32  ;;  %v707_v41 = vand.u32 2147483647, %v697_v32  ;;  %vm703_vm5 = vweird.f32 %v697_v32  ;;  %v835_v19 = vpop.f32.mrf.mxu2 }
 0x19f   :  { %1220 = vtanh.f32 %v692_v36  ;;  %v836_v21 = vadd.f32 %v1212_v18, %v835_v19  ;;  %v1215_v18 = vld [vmem:[%s1943_s8 + $0x8] ss:$0 sm:$0xff] }
 0x1a0   :  { %v710_v43 = vor.u32 1.1754944e-38, %v709_v39  ;;  %vm708_vm7 = vcmp.eq.f32.partialorder %v707_v41, 8.507059e+37 }
 0x1a1   :  { %v838_v25 = vmax.f32 %v836_v21, 0.0 }
 0x1a4   :  { %v1219_v35 = vpop.eup %1218 }
 0x1a5   :  { %v699_v37 = vmul.f32 %v1219_v35, %v697_v32  ;;  %vm704_vm4 = vweird.f32 %v1219_v35  ;;  %v1221_v45 = vpop.eup %1220 }
 0x1a6   :  { %vm705_vm6 = vmor %vm703_vm5, %vm704_vm4 }
 0x1a7   :  { %v700_v38 = vsub.f32 1.0, %v699_v37 }
 0x1a9   :  { %v701_v40 = vmul.f32 %v1219_v35, %v700_v38 }
 0x1ab   :  { %v702_v42 = vadd.f32 %v1219_v35, %v701_v40 }
 0x1ad   :  { %v706_v44 = vsel %vm705_vm6, %v1219_v35, %v702_v42 }
 0x1ae   :  { %v711_v46 = vsel %vm708_vm7, %v710_v43, %v706_v44  ;;  %v869_v43 = vlaneseq }
 0x1af   :  { %v714_v47 = vmul.f32 %v1221_v45, %v711_v46  ;;  %v873_v45 = vpop.permute.xlu1 %872 }
 0x1b0   :  { %v870_v44 = vand.u32 127, %v869_v43 }
 0x1b1   :  { %1222 = vtanh.f32 %v714_v47  ;;  %v913_v47 = vld [vmem:[%s1942_s7 + $0x68] sm:$0xff] }
 0x1b2   :  { %vm874_vm2 = vcmp.eq.s32.totalorder %v873_v45, %v870_v44  ;;  %958 = vmatpush.msra.mxu0 %v913_v47 }
 0x1b7   :  { %v1223_v48 = vpop.eup %1222 }
 0x1b8   :  { %717 = vrot.lane.b32.xlu0 %v1223_v48, %s1289_s10  ;;  %v912_v48 = vld [vmem:[%s1942_s7 + $0x60] sm:$0xff] }
 0x1b9   :  { %959 = vmatpush.msra.mxu0 %v912_v48 }
 0x1bb   :  { %960 = vmatpush.msra.mxu0 %v911_v50 }
 0x1bd   :  { %961 = vmatpush.msra.mxu0 %v910_v52 }
 0x1bf   :  { %962 = vmatpush.msra.mxu0 %v909_v56 }
 0x1c1   :  { %963 = vmatpush.msra.mxu0 %v908_v58 }
 0x1c3   :  { %964 = vmatpush.msra.mxu0 %v907_v59 }
 0x1c5   :  { %965 = vmatpush.msra.mxu0 %v906_v60 }
 0x22a   :  { %v718_v1 = vpop.permute.xlu0 %717 }
 0x22b   :  { %v720_v2 = vmul.f32 %v718_v1, %v711_v46  ;;  %v1190_v46 = vsel %vm874_vm2, 1.0, %v1288_v6  ;;  %v916_v6 = vld [vmem:[%s1942_s7 + $0x80] sm:$0xff] }
 0x22c   :  { %1192 = vmatmul.msk.f32.vlgmr.msrb.gmra.mxu2 %vm878_vm1, %v1190_v46 }
 0x22d   :  { %728 = vrot.lane.b32.xlu0 %v720_v2, %s1289_s10  ;;  %v918_v2 = vld [vmem:[%s1942_s7 + $0x90] sm:$0xff] }
 0x22e   :  { %988 = vmatpush.msrb.mxu1 %v918_v2 }
 0x29f   :  { %v729_v5 = vpop.permute.xlu0 %728 }
 0x2a0   :  { %1184 = vmatmul.msk.f32.vlgmr.msra.gmra.mxu3 %vm730_vm10, %v729_v5  ;;  %1185 = vmatmul.msk.f32.vlgmr.msra.gmra.mxu1 %vm730_vm10, %v729_v5  ;;  %v1003_v5 = vld [vmem:[%s1942_s7 + $0xc8] sm:$0xff]  ;;  %s1038_s7 = sshll.u32 %s1291_s3, 4  ;;  %s1039_s7 = int_to_ptr.vmem [resolvable:$true] %s1038_s7 }
 0x2a1   :  { %937 = vmatpush.msra.mxu3 %v917_v49  ;;  %1023 = vmatpush.msra.mxu2 %v1003_v5 }
 0x2a3   :  { %938 = vmatpush.msra.mxu3 %v916_v6  ;;  %1024 = vmatpush.msra.mxu2 %v1002_v7 }
 0x2a5   :  { %939 = vmatpush.msra.mxu3 %v915_v51  ;;  %1025 = vmatpush.msra.mxu2 %v1001_v8 }
 0x2a7   :  { %940 = vmatpush.msra.mxu3 %v914_v55  ;;  %1026 = vmatpush.msra.mxu2 %v1000_v9 }
 0x2a8   :  { %1189 = vmatmul.msk.f32.vlgmr.msrb.gmra.mxu3 %vm58_vm0, %v838_v25 }
 0x2af   :  { %v903_v3 = vpop.f32.mrf.mxu2 }
 0x2b0   :  { %1195 = vmatmul.msk.f32.vlgmr.msrb.gmra.mxu1 %vm58_vm0, %v903_v3 }
 0x31d   :  { %v770_v28 = vpop.f32.mrf.mxu1 }
 0x31e   :  { %v771_v30 = vadd.f32 %v770_v28, %v724_v27 }
 0x323   :  { %v750_v13 = vpop.f32.mrf.mxu3 }
 0x324   :  { %v751_v14 = vadd.f32 %v750_v13, %v723_v12 }
 0x326   :  { %v1186_v15 = vmul.f32 -1.442695, %v751_v14  ;;  %v1214_v14 = vld [vmem:[%s1943_s8 + $0x7] ss:$0 sm:$0xff] }
 0x328   :  { %1224 = vpow2.f32 %v1186_v15 }
 0x32b   :  { %v863_v62 = vpop.f32.mrf.mxu3 }
 0x32c   :  { %v864_v63 = vadd.f32 %v1213_v61, %v863_v62 }
 0x32d   :  { %v990_v12 = vpop.f32.mrf.mxu1 }
 0x32e   :  { %v1225_v23 = vpop.eup %1224  ;;  %1193 = vmatmul.msk.f32.vlgmr.msra.gmra.mxu3 %vm58_vm0, %v864_v63 }
 0x32f   :  { %v776_v24 = vadd.f32 1.0, %v1225_v23 }
 0x331   :  { %1226 = vrcp.f32 %v776_v24  ;;  %v788_v33 = vand.u32 2147483648, %v776_v24  ;;  %v786_v35 = vand.u32 2147483647, %v776_v24  ;;  %vm782_vm13 = vweird.f32 %v776_v24 }
 0x332   :  { %1228 = vtanh.f32 %v771_v30 }
 0x333   :  { %v789_v37 = vor.u32 1.1754944e-38, %v788_v33  ;;  %vm787_vm15 = vcmp.eq.f32.partialorder %v786_v35, 8.507059e+37 }
 0x337   :  { %v1227_v29 = vpop.eup %1226 }
 0x338   :  { %v778_v31 = vmul.f32 %v1227_v29, %v776_v24  ;;  %vm783_vm12 = vweird.f32 %v1227_v29  ;;  %v1229_v39 = vpop.eup %1228 }
 0x339   :  { %vm784_vm14 = vmor %vm782_vm13, %vm783_vm12 }
 0x33a   :  { %v779_v32 = vsub.f32 1.0, %v778_v31 }
 0x33c   :  { %v780_v34 = vmul.f32 %v1227_v29, %v779_v32 }
 0x33e   :  { %v781_v36 = vadd.f32 %v1227_v29, %v780_v34 }
 0x340   :  { %v785_v38 = vsel %vm784_vm14, %v1227_v29, %v781_v36 }
 0x341   :  { %v790_v40 = vsel %vm787_vm15, %v789_v37, %v785_v38 }
 0x342   :  { %v793_v41 = vmul.f32 %v1229_v39, %v790_v40 }
 0x344   :  { %1230 = vtanh.f32 %v793_v41 }
 0x34a   :  { %v1231_v42 = vpop.eup %1230 }
 0x34b   :  { %796 = vrot.lane.b32.xlu1 %v1231_v42, %s1289_s10 }
 0x3b1   :  { %v942_v10 = vpop.f32.mrf.mxu3 }
 0x3bd   :  { %v797_v0 = vpop.permute.xlu1 %796 }
 0x3be   :  { %v799_v1 = vmul.f32 %v797_v0, %v790_v40 }
 0x3c0   :  { %946 = vrot.lane.b32.xlu2 %v799_v1, %s1289_s10 }
 0x41a   :  { %v947_v4 = vpop.permute.xlu2 %946 }
 0x41b   :  { %1194 = vmatmul.msk.f32.vlgmr.msra.gmra.mxu0 %vm730_vm10, %v947_v4 }
 0x498   :  { %v967_v11 = vpop.f32.mrf.mxu0 }
 0x499   :  { %v968_v13 = vadd.f32 %v967_v11, %v942_v10 }
 0x49b   :  { %v993_v15 = vadd.f32 %v990_v12, %v968_v13 }
 0x49d   :  { %v998_v16 = vadd.f32 %v1214_v14, %v993_v15 }
 0x49f   :  { %v999_v17 = vmax.f32 %v998_v16, 0.0 }
 0x4a1   :  { %1196 = vmatmul.msk.f32.vlgmr.msra.gmra.mxu2 %vm58_vm0, %v999_v17 }
 0x524   :  { %v1028_v19 = vpop.f32.mrf.mxu2 }
 0x525   :  { %v1029_v20 = vadd.f32 %v1215_v18, %v1028_v19 }
 0x527   :  { %1032 = vst.msk [vmem:[#allocation8] sm:$0x3] %vm1031_vm3, %v1029_v20 }
 0x528   :  { %1043 = dma.vmem_to_hbm [thread:$0]  %s1039_s7, 32, %s1041_s21, [#allocation4]  }
 0x529   :  { %1284 = dma.done.wait [#allocation4], 32  }
 0x52a   :  { %1285 = vsyncadd [#allocation4], 4294967264 }
 0x52b   :  { %1048 = vsyncpa [#allocation4], 1 }
 0x52c   :  { %1049 = vsyncpa [#allocation5], 1 }
 0x52d   :  { %1050 = vsyncpa [#allocation7], 1 }

</bundles_post_ra>
